<compile_context>
chip_gen: v7x
topology: tpu7x:2x2x1
jax: 0.10.0
libtpu: 0.0.40
codegen_flags: <defaults>
</compile_context>

<pallas_src>
import functools

import jax
import jax.numpy as jnp
from jax.experimental import pallas as pl
from jax.experimental.pallas import tpu as pltpu


# ----------------------------------------------------------------------------
# Fused kernel: conv (k*k shifted matmuls) + instance-norm stats + affine + ReLU
# ----------------------------------------------------------------------------
def _fused_conv_in_relu_kernel(xp_ref, w_ref, b_ref, g_ref, be_ref, o_ref,
                               *, k, Ho, Wo, apply_norm, eps):
    # xp_ref: (1, Cin, Hp, Wp)  bf16  reflection-padded input (full image per sample)
    # w_ref:  (k*k, Cg, Cin)    bf16  conv weight, tap-major
    # b_ref:  (Cg, 1)           f32   conv bias (used only when the norm is skipped)
    # g_ref:  (Cg, 1)           f32   instance-norm gamma
    # be_ref: (Cg, 1)           f32   instance-norm beta
    # o_ref:  (1, Cg, Ho*Wo)    f32   conv+norm+ReLU output, HW flattened (lane-dense)
    HW = Ho * Wo
    xp = xp_ref[0]                                    # (Cin, Hp, Wp) bf16
    cin = xp.shape[0]

    # Conv as k*k shifted matmuls from the VMEM-resident padded block; f32 accumulation.
    acc = None
    for di in range(k):
        for dj in range(k):
            xs = xp[:, di:di + Ho, dj:dj + Wo].reshape(cin, HW)   # VMEM-local relayout
            wt = w_ref[di * k + dj]                               # (Cg, Cin) bf16
            part = jnp.dot(wt, xs, preferred_element_type=jnp.float32)
            acc = part if acc is None else acc + part             # (Cg, HW) f32

    if apply_norm:
        # Conv bias cancels exactly under instance norm -> never added.
        mean = jnp.mean(acc, axis=1, keepdims=True)               # (Cg, 1)
        cen = acc - mean
        var = jnp.mean(cen * cen, axis=1, keepdims=True)          # two-pass variance
        scale = g_ref[...] * jax.lax.rsqrt(var + eps)             # (Cg, 1)
        y = cen * scale + be_ref[...]
    else:
        # Norm skipped (Wo == 1): bias survives, no normalization.
        y = acc + b_ref[...]

    o_ref[0] = jnp.maximum(y, 0.0)


# ----------------------------------------------------------------------------
# Wrapper helpers (plain JAX: reflection pad, pixel shuffle)
# ----------------------------------------------------------------------------
def _pixel_shuffle_nchw(y, r):
    # y: (N, C*r*r, H, W) -> (N, C, H*r, W*r)   (matches nn.PixelShuffle)
    N, Crr, H, W = y.shape
    C = Crr // (r * r)
    y = y.reshape(N, C, r, r, H, W)
    y = jnp.transpose(y, (0, 1, 4, 2, 5, 3))
    return y.reshape(N, C, H * r, W * r)


# ----------------------------------------------------------------------------
# Full forward pass
# ----------------------------------------------------------------------------
def pixel_shuffle_c2d(x, conv_w, conv_b, in_gamma, in_beta,
                      *, kernel_size, stride, padding, eps=1e-5):
    """x: (N, Cin, H, W) NCHW f32.  Returns (N, out_planes, Ho*stride, Wo*stride) f32."""
    N, Cin, H, W = x.shape
    Cout = conv_w.shape[0]                      # = out_planes * stride**2
    k = kernel_size
    r = stride

    # ReflectionPad2d(padding)  (pure data movement, stays in XLA)
    if padding > 0:
        xp = jnp.pad(x, ((0, 0), (0, 0), (padding, padding), (padding, padding)),
                     mode="reflect")
    else:
        xp = x
    Hp, Wp = xp.shape[2], xp.shape[3]
    Ho, Wo = Hp - k + 1, Wp - k + 1
    HW = Ho * Wo

    # Static mirror of torch's runtime `if y.size(-1) != 1` (keys off Wo only, as torch does).
    apply_norm = (Wo != 1)

    # Channel groups: 2 when the per-group channel count stays a multiple of 8
    # (block-shape constraint), so v7x's second TensorCore has work even at N == 1.
    G = 2 if (Cout % 16 == 0) else 1
    Cg = Cout // G

    # bf16 MXU operands; all statistics / normalization math stays f32.
    xp_bf = xp.astype(jnp.bfloat16)                                        # (N, Cin, Hp, Wp)
    # Tap-major weight: (k*k, Cout, Cin) so the kernel indexes one tap per leading index.
    w_taps = jnp.transpose(conv_w, (2, 3, 0, 1)).reshape(k * k, Cout, Cin)
    w_taps = w_taps.astype(jnp.bfloat16)
    b_col = conv_b.reshape(Cout, 1).astype(jnp.float32)
    g_col = in_gamma.reshape(Cout, 1).astype(jnp.float32)
    be_col = in_beta.reshape(Cout, 1).astype(jnp.float32)

    kernel = functools.partial(_fused_conv_in_relu_kernel,
                               k=k, Ho=Ho, Wo=Wo, apply_norm=apply_norm, eps=eps)

    y_flat = pl.pallas_call(
        kernel,
        out_shape=jax.ShapeDtypeStruct((N, Cout, HW), jnp.float32),
        grid_spec=pltpu.PrefetchScalarGridSpec(
            num_scalar_prefetch=0,
            grid=(N, G),
            in_specs=[
                # Full padded image per sample; index constant in g -> DMA not repeated.
                pl.BlockSpec((1, Cin, Hp, Wp), lambda n, g: (n, 0, 0, 0)),
                pl.BlockSpec((k * k, Cg, Cin), lambda n, g: (0, g, 0)),
                pl.BlockSpec((Cg, 1), lambda n, g: (g, 0)),
                pl.BlockSpec((Cg, 1), lambda n, g: (g, 0)),
                pl.BlockSpec((Cg, 1), lambda n, g: (g, 0)),
            ],
            out_specs=pl.BlockSpec((1, Cg, HW), lambda n, g: (n, g, 0)),
        ),
        compiler_params=pltpu.CompilerParams(
            dimension_semantics=("parallel", "parallel")),
    )(xp_bf, w_taps, b_col, g_col, be_col)

    # (N, Cout, HW) -> (N, Cout, Ho, Wo) is free; pixel shuffle is one XLA transpose.
    y = y_flat.reshape(N, Cout, Ho, Wo)
    return _pixel_shuffle_nchw(y, r)


# ----------------------------------------------------------------------------
# Pure-JAX reference (for correctness check)
# ----------------------------------------------------------------------------
def reference(x, conv_w, conv_b, in_gamma, in_beta,
              *, kernel_size, stride, padding, eps=1e-5, bf16_inputs=False):
    if padding > 0:
        xp = jnp.pad(x, ((0, 0), (0, 0), (padding, padding), (padding, padding)),
                     mode="reflect")
    else:
        xp = x
    w = conv_w
    if bf16_inputs:
        # Round conv operands to bf16 (f32 accumulation) to mirror the kernel's MXU math.
        xp = xp.astype(jnp.bfloat16).astype(jnp.float32)
        w = w.astype(jnp.bfloat16).astype(jnp.float32)
    y = jax.lax.conv_general_dilated(
        xp, w, window_strides=(1, 1), padding="VALID",
        dimension_numbers=("NCHW", "OIHW", "NCHW"))
    y = y + conv_b.reshape(1, -1, 1, 1)
    if y.shape[-1] != 1:
        mean = jnp.mean(y, axis=(2, 3), keepdims=True)
        var = jnp.mean((y - mean) ** 2, axis=(2, 3), keepdims=True)
        y = (y - mean) * jax.lax.rsqrt(var + eps)
        y = y * in_gamma.reshape(1, -1, 1, 1) + in_beta.reshape(1, -1, 1, 1)
    y = jnp.maximum(y, 0.0)
    return _pixel_shuffle_nchw(y, stride)


if __name__ == "__main__":
    # Small config consistent with the module.
    in_planes, out_planes = 4, 4
    kernel_size, stride, padding = 3, 2, 1
    ps_in_planes = out_planes * stride ** 2          # 16

    N, H, W = 2, 16, 16
    key = jax.random.PRNGKey(0)
    k1, k2, k3, k4, k5 = jax.random.split(key, 5)

    x = jax.random.normal(k1, (N, in_planes, H, W), dtype=jnp.float32)
    conv_w = 0.1 * jax.random.normal(
        k2, (ps_in_planes, in_planes, kernel_size, kernel_size), dtype=jnp.float32)
    conv_b = 0.1 * jax.random.normal(k3, (ps_in_planes,), dtype=jnp.float32)
    in_gamma = 1.0 + 0.05 * jax.random.normal(k4, (ps_in_planes,), dtype=jnp.float32)
    in_beta = 0.05 * jax.random.normal(k5, (ps_in_planes,), dtype=jnp.float32)

    out = pixel_shuffle_c2d(x, conv_w, conv_b, in_gamma, in_beta,
                            kernel_size=kernel_size, stride=stride, padding=padding)
    out = jax.block_until_ready(out)

    assert out.shape == (N, out_planes, H * stride, W * stride), out.shape

    # Tight check: reference with the same bf16-rounded conv operands (f32 accumulation)
    # isolates the kernel logic (only accumulation-order differences remain).
    ref_bf16 = jax.block_until_ready(
        reference(x, conv_w, conv_b, in_gamma, in_beta, kernel_size=kernel_size,
                  stride=stride, padding=padding, bf16_inputs=True))
    err_t = float(jnp.max(jnp.abs(out - ref_bf16)))
    assert jnp.allclose(out, ref_bf16, atol=5e-3, rtol=5e-3), err_t

    # Fidelity check vs. the all-f32 torch-faithful reference: bf16 MXU operands give
    # ~1e-3-level absolute differences on the O(1) normalized outputs.
    ref_f32 = jax.block_until_ready(
        reference(x, conv_w, conv_b, in_gamma, in_beta, kernel_size=kernel_size,
                  stride=stride, padding=padding))
    err_f = float(jnp.max(jnp.abs(out - ref_f32)))
    assert jnp.allclose(out, ref_f32, atol=3e-2, rtol=3e-2), err_f

    print("KERNEL_OK")
</pallas_src>

<mosaic_0001>
module attributes {stable_mosaic.version = 11 : i64} {
  func.func @_fused_conv_in_relu_kernel(%arg0: i32, %arg1: i32, %arg2: memref<1x4x18x18xbf16, #tpu.memory_space<vmem>>, %arg3: memref<9x8x4xbf16, #tpu.memory_space<vmem>>, %arg4: memref<8x1xf32, #tpu.memory_space<vmem>>, %arg5: memref<8x1xf32, #tpu.memory_space<vmem>>, %arg6: memref<8x1xf32, #tpu.memory_space<vmem>>, %arg7: memref<1x8x256xf32, #tpu.memory_space<vmem>>) attributes {dimension_semantics = [#tpu.dimension_semantics<parallel>, #tpu.dimension_semantics<parallel>], iteration_bounds = array<i64: 2, 2>, scalar_prefetch = 0 : i64, scratch_operands = 0 : i64, tpu.core_type = #tpu.core_type<tc>, window_params = [{transform_indices = @transform_0, window_bounds = array<i64: 1, 4, 18, 18>}, {transform_indices = @transform_1, window_bounds = array<i64: 9, 8, 4>}, {transform_indices = @transform_2, window_bounds = array<i64: 8, 1>}, {transform_indices = @transform_3, window_bounds = array<i64: 8, 1>}, {transform_indices = @transform_4, window_bounds = array<i64: 8, 1>}, {transform_indices = @transform_5, window_bounds = array<i64: 1, 8, 256>}]} {
    %c0 = arith.constant 0 : index
    %c0_0 = arith.constant 0 : index
    %c0_1 = arith.constant 0 : index
    %c0_2 = arith.constant 0 : index
    %0 = vector.load %arg2[%c0, %c0_0, %c0_1, %c0_2] : memref<1x4x18x18xbf16, #tpu.memory_space<vmem>>, vector<1x4x18x18xbf16>
    %1 = vector.shape_cast %0 : vector<1x4x18x18xbf16> to vector<4x18x18xbf16>
    %2 = vector.extract_strided_slice %1 {offsets = [0, 0, 0], sizes = [4, 16, 16], strides = [1, 1, 1]} : vector<4x18x18xbf16> to vector<4x16x16xbf16>
    %3 = vector.shape_cast %2 : vector<4x16x16xbf16> to vector<4x256xbf16>
    %c0_3 = arith.constant 0 : index
    %c0_4 = arith.constant 0 : index
    %c0_5 = arith.constant 0 : index
    %4 = vector.load %arg3[%c0_3, %c0_4, %c0_5] : memref<9x8x4xbf16, #tpu.memory_space<vmem>>, vector<1x8x4xbf16>
    %5 = vector.shape_cast %4 : vector<1x8x4xbf16> to vector<8x4xbf16>
    %cst = arith.constant dense<0.000000e+00> : vector<8x256xf32>
    %6 = tpu.matmul %5, %3, %cst {dimension_numbers = #tpu.dot_dimension_numbers<[1], [0], [0], [1], [0, 0, 1, 1], [], []>} : vector<8x4xbf16>, vector<4x256xbf16>, vector<8x256xf32> -> vector<8x256xf32>
    %7 = vector.extract_strided_slice %1 {offsets = [0, 0, 1], sizes = [4, 16, 16], strides = [1, 1, 1]} : vector<4x18x18xbf16> to vector<4x16x16xbf16>
    %8 = vector.shape_cast %7 : vector<4x16x16xbf16> to vector<4x256xbf16>
    %c1 = arith.constant 1 : index
    %c0_6 = arith.constant 0 : index
    %c0_7 = arith.constant 0 : index
    %9 = vector.load %arg3[%c1, %c0_6, %c0_7] : memref<9x8x4xbf16, #tpu.memory_space<vmem>>, vector<1x8x4xbf16>
    %10 = vector.shape_cast %9 : vector<1x8x4xbf16> to vector<8x4xbf16>
    %cst_8 = arith.constant dense<0.000000e+00> : vector<8x256xf32>
    %11 = tpu.matmul %10, %8, %cst_8 {dimension_numbers = #tpu.dot_dimension_numbers<[1], [0], [0], [1], [0, 0, 1, 1], [], []>} : vector<8x4xbf16>, vector<4x256xbf16>, vector<8x256xf32> -> vector<8x256xf32>
    %12 = arith.addf %6, %11 : vector<8x256xf32>
    %13 = vector.extract_strided_slice %1 {offsets = [0, 0, 2], sizes = [4, 16, 16], strides = [1, 1, 1]} : vector<4x18x18xbf16> to vector<4x16x16xbf16>
    %14 = vector.shape_cast %13 : vector<4x16x16xbf16> to vector<4x256xbf16>
    %c2 = arith.constant 2 : index
    %c0_9 = arith.constant 0 : index
    %c0_10 = arith.constant 0 : index
    %15 = vector.load %arg3[%c2, %c0_9, %c0_10] : memref<9x8x4xbf16, #tpu.memory_space<vmem>>, vector<1x8x4xbf16>
    %16 = vector.shape_cast %15 : vector<1x8x4xbf16> to vector<8x4xbf16>
    %cst_11 = arith.constant dense<0.000000e+00> : vector<8x256xf32>
    %17 = tpu.matmul %16, %14, %cst_11 {dimension_numbers = #tpu.dot_dimension_numbers<[1], [0], [0], [1], [0, 0, 1, 1], [], []>} : vector<8x4xbf16>, vector<4x256xbf16>, vector<8x256xf32> -> vector<8x256xf32>
    %18 = arith.addf %12, %17 : vector<8x256xf32>
    %19 = vector.extract_strided_slice %1 {offsets = [0, 1, 0], sizes = [4, 16, 16], strides = [1, 1, 1]} : vector<4x18x18xbf16> to vector<4x16x16xbf16>
    %20 = vector.shape_cast %19 : vector<4x16x16xbf16> to vector<4x256xbf16>
    %c3 = arith.constant 3 : index
    %c0_12 = arith.constant 0 : index
    %c0_13 = arith.constant 0 : index
    %21 = vector.load %arg3[%c3, %c0_12, %c0_13] : memref<9x8x4xbf16, #tpu.memory_space<vmem>>, vector<1x8x4xbf16>
    %22 = vector.shape_cast %21 : vector<1x8x4xbf16> to vector<8x4xbf16>
    %cst_14 = arith.constant dense<0.000000e+00> : vector<8x256xf32>
    %23 = tpu.matmul %22, %20, %cst_14 {dimension_numbers = #tpu.dot_dimension_numbers<[1], [0], [0], [1], [0, 0, 1, 1], [], []>} : vector<8x4xbf16>, vector<4x256xbf16>, vector<8x256xf32> -> vector<8x256xf32>
    %24 = arith.addf %18, %23 : vector<8x256xf32>
    %25 = vector.extract_strided_slice %1 {offsets = [0, 1, 1], sizes = [4, 16, 16], strides = [1, 1, 1]} : vector<4x18x18xbf16> to vector<4x16x16xbf16>
    %26 = vector.shape_cast %25 : vector<4x16x16xbf16> to vector<4x256xbf16>
    %c4 = arith.constant 4 : index
    %c0_15 = arith.constant 0 : index
    %c0_16 = arith.constant 0 : index
    %27 = vector.load %arg3[%c4, %c0_15, %c0_16] : memref<9x8x4xbf16, #tpu.memory_space<vmem>>, vector<1x8x4xbf16>
    %28 = vector.shape_cast %27 : vector<1x8x4xbf16> to vector<8x4xbf16>
    %cst_17 = arith.constant dense<0.000000e+00> : vector<8x256xf32>
    %29 = tpu.matmul %28, %26, %cst_17 {dimension_numbers = #tpu.dot_dimension_numbers<[1], [0], [0], [1], [0, 0, 1, 1], [], []>} : vector<8x4xbf16>, vector<4x256xbf16>, vector<8x256xf32> -> vector<8x256xf32>
    %30 = arith.addf %24, %29 : vector<8x256xf32>
    %31 = vector.extract_strided_slice %1 {offsets = [0, 1, 2], sizes = [4, 16, 16], strides = [1, 1, 1]} : vector<4x18x18xbf16> to vector<4x16x16xbf16>
    %32 = vector.shape_cast %31 : vector<4x16x16xbf16> to vector<4x256xbf16>
    %c5 = arith.constant 5 : index
    %c0_18 = arith.constant 0 : index
    %c0_19 = arith.constant 0 : index
    %33 = vector.load %arg3[%c5, %c0_18, %c0_19] : memref<9x8x4xbf16, #tpu.memory_space<vmem>>, vector<1x8x4xbf16>
    %34 = vector.shape_cast %33 : vector<1x8x4xbf16> to vector<8x4xbf16>
    %cst_20 = arith.constant dense<0.000000e+00> : vector<8x256xf32>
    %35 = tpu.matmul %34, %32, %cst_20 {dimension_numbers = #tpu.dot_dimension_numbers<[1], [0], [0], [1], [0, 0, 1, 1], [], []>} : vector<8x4xbf16>, vector<4x256xbf16>, vector<8x256xf32> -> vector<8x256xf32>
    %36 = arith.addf %30, %35 : vector<8x256xf32>
    %37 = vector.extract_strided_slice %1 {offsets = [0, 2, 0], sizes = [4, 16, 16], strides = [1, 1, 1]} : vector<4x18x18xbf16> to vector<4x16x16xbf16>
    %38 = vector.shape_cast %37 : vector<4x16x16xbf16> to vector<4x256xbf16>
    %c6 = arith.constant 6 : index
    %c0_21 = arith.constant 0 : index
    %c0_22 = arith.constant 0 : index
    %39 = vector.load %arg3[%c6, %c0_21, %c0_22] : memref<9x8x4xbf16, #tpu.memory_space<vmem>>, vector<1x8x4xbf16>
    %40 = vector.shape_cast %39 : vector<1x8x4xbf16> to vector<8x4xbf16>
    %cst_23 = arith.constant dense<0.000000e+00> : vector<8x256xf32>
    %41 = tpu.matmul %40, %38, %cst_23 {dimension_numbers = #tpu.dot_dimension_numbers<[1], [0], [0], [1], [0, 0, 1, 1], [], []>} : vector<8x4xbf16>, vector<4x256xbf16>, vector<8x256xf32> -> vector<8x256xf32>
    %42 = arith.addf %36, %41 : vector<8x256xf32>
    %43 = vector.extract_strided_slice %1 {offsets = [0, 2, 1], sizes = [4, 16, 16], strides = [1, 1, 1]} : vector<4x18x18xbf16> to vector<4x16x16xbf16>
    %44 = vector.shape_cast %43 : vector<4x16x16xbf16> to vector<4x256xbf16>
    %c7 = arith.constant 7 : index
    %c0_24 = arith.constant 0 : index
    %c0_25 = arith.constant 0 : index
    %45 = vector.load %arg3[%c7, %c0_24, %c0_25] : memref<9x8x4xbf16, #tpu.memory_space<vmem>>, vector<1x8x4xbf16>
    %46 = vector.shape_cast %45 : vector<1x8x4xbf16> to vector<8x4xbf16>
    %cst_26 = arith.constant dense<0.000000e+00> : vector<8x256xf32>
    %47 = tpu.matmul %46, %44, %cst_26 {dimension_numbers = #tpu.dot_dimension_numbers<[1], [0], [0], [1], [0, 0, 1, 1], [], []>} : vector<8x4xbf16>, vector<4x256xbf16>, vector<8x256xf32> -> vector<8x256xf32>
    %48 = arith.addf %42, %47 : vector<8x256xf32>
    %49 = vector.extract_strided_slice %1 {offsets = [0, 2, 2], sizes = [4, 16, 16], strides = [1, 1, 1]} : vector<4x18x18xbf16> to vector<4x16x16xbf16>
    %50 = vector.shape_cast %49 : vector<4x16x16xbf16> to vector<4x256xbf16>
    %c8 = arith.constant 8 : index
    %c0_27 = arith.constant 0 : index
    %c0_28 = arith.constant 0 : index
    %51 = vector.load %arg3[%c8, %c0_27, %c0_28] : memref<9x8x4xbf16, #tpu.memory_space<vmem>>, vector<1x8x4xbf16>
    %52 = vector.shape_cast %51 : vector<1x8x4xbf16> to vector<8x4xbf16>
    %cst_29 = arith.constant dense<0.000000e+00> : vector<8x256xf32>
    %53 = tpu.matmul %52, %50, %cst_29 {dimension_numbers = #tpu.dot_dimension_numbers<[1], [0], [0], [1], [0, 0, 1, 1], [], []>} : vector<8x4xbf16>, vector<4x256xbf16>, vector<8x256xf32> -> vector<8x256xf32>
    %54 = arith.addf %48, %53 : vector<8x256xf32>
    %cst_30 = arith.constant dense<0.000000e+00> : vector<8xf32>
    %55 = vector.multi_reduction <add>, %54, %cst_30 [1] : vector<8x256xf32> to vector<8xf32>
    %56 = vector.shape_cast %55 : vector<8xf32> to vector<8x1xf32>
    %cst_31 = arith.constant 2.560000e+02 : f32
    %57 = vector.broadcast %cst_31 : f32 to vector<8x1xf32>
    %58 = arith.divf %56, %57 : vector<8x1xf32>
    %59 = vector.broadcast %58 : vector<8x1xf32> to vector<8x256xf32>
    %60 = arith.subf %54, %59 : vector<8x256xf32>
    %61 = arith.mulf %60, %60 : vector<8x256xf32>
    %cst_32 = arith.constant dense<0.000000e+00> : vector<8xf32>
    %62 = vector.multi_reduction <add>, %61, %cst_32 [1] : vector<8x256xf32> to vector<8xf32>
    %63 = vector.shape_cast %62 : vector<8xf32> to vector<8x1xf32>
    %cst_33 = arith.constant 2.560000e+02 : f32
    %64 = vector.broadcast %cst_33 : f32 to vector<8x1xf32>
    %65 = arith.divf %63, %64 : vector<8x1xf32>
    %c0_34 = arith.constant 0 : index
    %c0_35 = arith.constant 0 : index
    %66 = vector.load %arg5[%c0_34, %c0_35] : memref<8x1xf32, #tpu.memory_space<vmem>>, vector<8x1xf32>
    %cst_36 = arith.constant 9.99999974E-6 : f32
    %67 = vector.broadcast %cst_36 : f32 to vector<8x1xf32>
    %68 = arith.addf %65, %67 : vector<8x1xf32>
    %69 = math.rsqrt %68 : vector<8x1xf32>
    %70 = arith.mulf %66, %69 : vector<8x1xf32>
    %71 = vector.broadcast %70 : vector<8x1xf32> to vector<8x256xf32>
    %72 = arith.mulf %60, %71 : vector<8x256xf32>
    %c0_37 = arith.constant 0 : index
    %c0_38 = arith.constant 0 : index
    %73 = vector.load %arg6[%c0_37, %c0_38] : memref<8x1xf32, #tpu.memory_space<vmem>>, vector<8x1xf32>
    %74 = vector.broadcast %73 : vector<8x1xf32> to vector<8x256xf32>
    %75 = arith.addf %72, %74 : vector<8x256xf32>
    %cst_39 = arith.constant 0.000000e+00 : f32
    %76 = vector.broadcast %cst_39 : f32 to vector<8x256xf32>
    %77 = arith.maximumf %75, %76 : vector<8x256xf32>
    %c0_40 = arith.constant 0 : index
    %c0_41 = arith.constant 0 : index
    %c0_42 = arith.constant 0 : index
    %78 = vector.load %arg7[%c0_40, %c0_41, %c0_42] : memref<1x8x256xf32, #tpu.memory_space<vmem>>, vector<1x8x256xf32>
    %79 = vector.shape_cast %78 : vector<1x8x256xf32> to vector<8x256xf32>
    %80 = vector.shape_cast %77 : vector<8x256xf32> to vector<1x8x256xf32>
    tpu.vector_store %arg7[%c0_40, %c0_41, %c0_42], %80 {strides = array<i32>} : memref<1x8x256xf32, #tpu.memory_space<vmem>>, vector<1x8x256xf32>,
    return
  }
  func.func @transform_0(%arg0: i32, %arg1: i32) -> (i32, i32, i32, i32) {
    %c0_i32 = arith.constant 0 : i32
    %c0_i32_0 = arith.constant 0 : i32
    %c0_i32_1 = arith.constant 0 : i32
    %c0_i32_2 = arith.constant 0 : i32
    return %arg0, %c0_i32, %c0_i32_0, %c0_i32_1 : i32, i32, i32, i32
  }
  func.func @transform_1(%arg0: i32, %arg1: i32) -> (i32, i32, i32) {
    %c0_i32 = arith.constant 0 : i32
    %c0_i32_0 = arith.constant 0 : i32
    %c0_i32_1 = arith.constant 0 : i32
    return %c0_i32, %arg1, %c0_i32_0 : i32, i32, i32
  }
  func.func @transform_2(%arg0: i32, %arg1: i32) -> (i32, i32) {
    %c0_i32 = arith.constant 0 : i32
    %c0_i32_0 = arith.constant 0 : i32
    return %arg1, %c0_i32 : i32, i32
  }
  func.func @transform_3(%arg0: i32, %arg1: i32) -> (i32, i32) {
    %c0_i32 = arith.constant 0 : i32
    %c0_i32_0 = arith.constant 0 : i32
    return %arg1, %c0_i32 : i32, i32
  }
  func.func @transform_4(%arg0: i32, %arg1: i32) -> (i32, i32) {
    %c0_i32 = arith.constant 0 : i32
    %c0_i32_0 = arith.constant 0 : i32
    return %arg1, %c0_i32 : i32, i32
  }
  func.func @transform_5(%arg0: i32, %arg1: i32) -> (i32, i32, i32) {
    %c0_i32 = arith.constant 0 : i32
    %c0_i32_0 = arith.constant 0 : i32
    return %arg0, %arg1, %c0_i32 : i32, i32, i32
  }
}

</mosaic_0001>

<bundles_post_ra>
// kernel: tpu_custom_call.1
= control target key start
LH: loop header
LB: loop body
LE: loop exit
PB: predicated region body
PF: predicated region fallthrough
CT: control target
= control target key end

     0   :  { %s5847_s0 = inlined_call_operand.vmem [shape: bf16[2,4,18,18], index: 0, kind: input, shape index: {}]   ;;  %s5848_s1 = inlined_call_operand.vmem [shape: bf16[9,16,4], index: 1, kind: input, shape index: {}]   ;;  %s5849_s2 = inlined_call_operand.vmem [shape: f32[16,1], index: 2, kind: input, shape index: {}]   ;;  %s5850_s3 = inlined_call_operand.vmem [shape: f32[16,1], index: 3, kind: input, shape index: {}]   ;;  %s5851_s4 = inlined_call_operand.vmem [shape: f32[16,1], index: 4, kind: input, shape index: {}]   ;;  %s5852_s5 = inlined_call_operand.hbm [shape: f32[2,16,256], index: 5, kind: output, shape index: {}]  }
   0x1   :  { %5889 = sst [smem:[#allocation19_spill]] %s5847_s0 }
   0x2   :  { %10 = vsyncpa [#allocation4], 0 }
   0x3   :  { %12 = vsyncpa [#allocation4 + $0x1], 0  ;;  %s4143_s18 = smov 0   ;;  %s4145_s19 = smov 0  }
   0x4   :  { %s4147_s20 = smov 0   ;;  %s4149_s21 = smov 0  }
   0x5   :  { %s4151_s2 = smov 0   ;;  %s4153_s22 = smov 0  }
   0x6   :  { %s4155_s23 = smov 0   ;;  %s4157_s24 = smov 0  }
   0x7   :  { %s4159_s25 = smov 0   ;;  %s4161_s26 = smov 0  }
   0x8 LB: > { %s3608_s27 = sadd.s32 4294967295, %s4098_s26   ;;  %s3609_s28 = sadd.s32 4294967294, %s4098_s26   ;;  %s4098_s26 = sphi %s4161_s26, %s18_s26   ;;  %s4094_s25 = sphi %s4159_s25, %s5969_s25   ;;  %s4090_s24 = sphi %s4157_s24, %s5968_s24   ;;  %s4086_s23 = sphi %s4155_s23, %s5967_s23   ;;  %s4082_s22 = sphi %s4153_s22, %s5966_s22   ;;  %s4078_s2 = sphi %s4151_s2, %s5965_s2   ;;  %s4074_s21 = sphi %s4149_s21, %s5964_s21   ;;  %s4070_s20 = sphi %s4147_s20, %s5963_s20   ;;  %s4066_s19 = sphi %s4145_s19, %s5962_s19   ;;  %s4062_s18 = sphi %s4143_s18, %s5961_s18  }
   0x9   : > { %s27_s29 = sadd.s32 1, %s4090_s24  ;;  %s30_s30 = sadd.s32 1, %s4094_s25 }
   0xa   : > { %p28_p0 = scmp.ge.s32.totalorder %s27_s29, 2  ;;  %s63_s6 = sadd.s32 1, %s4078_s2 }
   0xb   : > { %p70_p1 = scmp.ne.s32.totalorder %s4078_s2, %s4074_s21  ;;  %p71_p2 = scmp.eq.s32.totalorder %s4098_s26, 0 }
   0xc   : > { %s5971_s29 = smov (%p28_p0, %s27_s29), 0  ;;  %s5973_s30 = smov (!%p28_p0, %s30_s30), %s4094_s25 }
   0xd   : > { %s60_s7 = ssub.s32 %s4090_s24, %s5971_s29  ;;  %p4206_p3 = por %p71_p2, %p70_p1 }
   0xe   : > { %p32_p4 = scmp.ge.s32.totalorder %s5973_s30, 2  ;;  %p61_p5 = scmp.eq.s32.totalorder %s60_s7, 0 }
   0xf   : > { %s169_s9 = sadd.s32 1, %s4070_s20  ;;  %p179_p6 = scmp.ne.s32.totalorder %s4070_s20, %s4066_s19 }
  0x10   : > { %s5975_s30 = smov (%p32_p4, %s5973_s30), 0  ;;  %p180_p7 = scmp.eq.s32.totalorder %s3608_s27, 3 }
  0x11   : > { %s4216_s10 = scalar_select %p61_p5, %s4078_s2, %s63_s6  }
  0x12   : > { %s164_s11 = ssub.s32 %s4094_s25, %s5975_s30  ;;  %p185_p8 = scmp.ne.s32.totalorder %s4066_s19, %s4062_s18 }
  0x13   : > { %s166_s12 = sor.u32 %s164_s11, %s60_s7  ;;  %p4222_p10 = por %p180_p7, %p179_p6 }
  0x14   : > { %p167_p9 = scmp.eq.s32.totalorder %s166_s12, 0  ;;  %p186_p11 = scmp.eq.s32.totalorder %s3609_s28, 3 }
  0x15   : > { %p3611_p13 = scmp.ge.s32.totalorder %s4098_s26, 4 }
  0x16   : > { %s4227_s14 = scalar_select %p167_p9, %s4070_s20, %s169_s9  }
  0x17   : > { %p4229_p12 = por %p186_p11, %p185_p8  ;;  %202 = sbr.rel (%p3611_p13) target bundleno = 40 (0x28), region = 16 }
  0x1e   : > { %213 = sbr.rel (!%p4206_p3) target bundleno = 40 (0x28), region = 24  ;;  %s215_s16 = sand.u32 (%p4206_p3), 1, %s4078_s2  }
  0x1f   : > { %s3612_s17 = sshll.u32 (%p4206_p3), %s4090_s24, 2  ;;  %s3882_s27 = smul.u32 (%p4206_p3), 36, %s215_s16 }
  0x20   : > { %s219_s28 = scalar_lea.vmem (%p4206_p3), %s5848_s1, %s3612_s17 }
  0x21   : > { %v235_v0 = vld [vmem:[%s219_s28] sm:$0xf] (%p4206_p3)  ;;  %v237_v1 = vld [vmem:[%s219_s28 + $0x8] sm:$0xf] (%p4206_p3)  ;;  %v239_v2 = vld [vmem:[%s219_s28 + $0x10] sm:$0xf] (%p4206_p3) }
  0x22   : > { %v241_v3 = vld [vmem:[%s219_s28 + $0x18] sm:$0xf] (%p4206_p3)  ;;  %v243_v4 = vld [vmem:[%s219_s28 + $0x20] sm:$0xf] (%p4206_p3)  ;;  %s217_s9 = scalar_lea.vmem (%p4206_p3), [#allocation2], %s3882_s27 }
  0x23   : > { %236 = vst [vmem:[%s217_s9] sm:$0xf] (%p4206_p3), %v235_v0  ;;  %238 = vst [vmem:[%s217_s9 + $0x4] sm:$0xf] (%p4206_p3), %v237_v1  ;;  %v245_v5 = vld [vmem:[%s219_s28 + $0x28] sm:$0xf] (%p4206_p3) }
  0x24   : > { %240 = vst [vmem:[%s217_s9 + $0x8] sm:$0xf] (%p4206_p3), %v239_v2  ;;  %242 = vst [vmem:[%s217_s9 + $0xc] sm:$0xf] (%p4206_p3), %v241_v3  ;;  %v247_v6 = vld [vmem:[%s219_s28 + $0x30] sm:$0xf] (%p4206_p3) }
  0x25   : > { %244 = vst [vmem:[%s217_s9 + $0x10] sm:$0xf] %v243_v4  ;;  %v249_v7 = vld [vmem:[%s219_s28 + $0x38] sm:$0xf]  ;;  %246 = vst [vmem:[%s217_s9 + $0x14] sm:$0xf] %v245_v5 }
  0x26   : > { %248 = vst [vmem:[%s217_s9 + $0x18] sm:$0xf] %v247_v6  ;;  %250 = vst [vmem:[%s217_s9 + $0x1c] sm:$0xf] %v249_v7  ;;  %v251_v8 = vld [vmem:[%s219_s28 + $0x40] sm:$0xf] }
  0x27   : > { %252 = vst [vmem:[%s217_s9 + $0x20] sm:$0xf] %v251_v8 }
  0x28 PF: > { %p3613_p0 = scmp.ge.s32.totalorder %s4098_s26, 1  ;;  %p313_p1 = scmp.lt.s32.totalorder %s4098_s26, 5 }
  0x2a   : > { %p314_p2 = pnand %p3613_p0, %p313_p1 }
  0x2c   : > { %317 = sbr.rel (%p314_p2) target bundleno = 1262 (0x4ee), region = 77 }
  0x33   : > { %p364_p3 = scmp.lt.s32.totalorder %s4086_s23, 1  ;;  %s5893_s0 = sld [smem:[#allocation19_spill]]  ;;  %vm1374_vm0 = vsmask.f32 3328  ;;  %vm1375_vm1 = vsmask.f32 7440 }
  0x34   : > { %s4100_s27 = smov 127   ;;  %vm4298_vm2 = vmor %vm1374_vm0, %vm1375_vm1  ;;  %s4101_s6 = smov 126   ;;  %vm2429_vm3 = vcmask 1042432   ;;  %vm2430_vm4 = vcmask 1046532   ;;  %vm624_vm6 = vcmask 130048   ;;  %vm628_vm7 = vcmask 261120  }
  0x35   : > { %s365_s8 = scalar_select %p364_p3, %s4086_s23, 1  ;;  %vm4445_vm5 = vmor %vm2429_vm3, %vm2430_vm4  ;;  %vm631_vm8 = vcmask 392192   ;;  %vm634_vm9 = vcmask 523264   ;;  %vm637_vm10 = vcmask 654336   ;;  %vm640_vm11 = vcmask 785408  }
  0x36   : > { %s4104_s7 = smov 32   ;;  %s4105_s28 = smov 16   ;;  %vm643_vm12 = vcmask 916480   ;;  %vm952_vm13 = vcmask 1041408   ;;  %vm948_vm14 = vcmask 31744  }
  0x37   : > { %s3884_s11 = smul.u32 48, %s365_s8  ;;  %s4106_s9 = smov 48  }
  0x38   : > { %s4107_s8 = smov 64   ;;  %s4109_s12 = smov 80  }
  0x39   : > { %s4248_s17 = scalar_lea.vmem %s5893_s0, %s3884_s11  ;;  %s4108_s11 = smov 96  }
  0x3a   : > { %v4251_v9 = vld [vmem:[%s4248_s17 + $0x4] sm:$0xf]  ;;  %v4254_v10 = vld [vmem:[%s4248_s17] sm:$0xf]  ;;  %v4257_v11 = vld [vmem:[%s4248_s17 + $0xc] sm:$0xf] }
  0x3b   : > { %672 = vrot.lane.b32.xlu1 %v4251_v9, %s4100_s27  ;;  %670 = vrot.lane.b32.xlu0 %v4254_v10, %s4100_s27  ;;  %v4264_v12 = vld [vmem:[%s4248_s17 + $0x10] sm:$0xf]  ;;  %v5855_v13 = vshrl.u32 %v4257_v11, 16  ;;  %v1399_v14 = vshll.u32 %v4257_v11, 16  ;;  %v5856_v15 = vshrl.u32 %v4254_v10, 16  ;;  %v1379_v16 = vshll.u32 %v4254_v10, 16 }
  0x3c   : > { %v1404_v17 = vshll.u32 %v4264_v12, 16  ;;  %v1384_v18 = vshll.u32 %v4251_v9, 16  ;;  %v4273_v19 = vld [vmem:[%s4248_s17 + $0x14] sm:$0x1]  ;;  %v5859_v20 = vshrl.u32 %v4264_v12, 16  ;;  %v5860_v21 = vshrl.u32 %v4251_v9, 16 }
  0x3d   : > { %v1398_v22 = vrot.slane %v5855_v13, 4  ;;  %v1401_v23 = vrot.slane %v1399_v14, 5  ;;  %v1378_v24 = vrot.slane %v5856_v15, 4  ;;  %v1381_v25 = vrot.slane %v1379_v16, 5  ;;  %v4282_v26 = vld [vmem:[%s4248_s17 + $0x8] sm:$0x1] }
  0x3e   : > { %v1406_v27 = vrot.slane %v1404_v17, 5  ;;  %v1386_v28 = vrot.slane %v1384_v18, 5  ;;  %v1409_v29 = vrot.slane %v5859_v20, 4  ;;  %v1413_v30 = vshll.u32 %v4273_v19, 16  ;;  %v4288_v31 = vld [vmem:[%s4248_s17 + $0x1c] sm:$0xf] }
  0x3f   : > { %v1402_v32 = vor.u32 %v1401_v23, %v1398_v22  ;;  %v1382_v33 = vor.u32 %v1381_v25, %v1378_v24  ;;  %v1389_v34 = vrot.slane %v5860_v21, 4  ;;  %v1393_v35 = vshll.u32 %v4282_v26, 16  ;;  %v4294_v36 = vld [vmem:[%s4248_s17 + $0x20] sm:$0x1]  ;;  %v4305_v42 = vld [vmem:[%s4248_s17 + $0x18] sm:$0xf] }
  0x40   : > { %v1410_v38 = vor.u32 %v1409_v29, %v1406_v27  ;;  %v1415_v39 = vrot.slane %v1413_v30, 5  ;;  %v5858_v40 = vshrl.u32 %v4288_v31, 16  ;;  %v1424_v41 = vshll.u32 %v4288_v31, 16  ;;  %v4332_v59 = vld [vmem:[%s4248_s17 + $0x28] sm:$0xf]  ;;  %s4110_s16 = smov 112  }
  0x41   : > { %v1403_v43 = vrot.slane %v1402_v32, 4  ;;  %v1383_v44 = vrot.slane %v1382_v33, 4  ;;  %v1390_v45 = vor.u32 %v1389_v34, %v1386_v28  ;;  %v1395_v46 = vrot.slane %v1393_v35, 5  ;;  %v4345_v3 = vld [vmem:[%s4248_s17 + $0x2c] sm:$0x1]  ;;  %p373_p4 = scmp.lt.s32.totalorder %s4082_s22, 1 }
  0x42   : > { %v1411_v47 = vrot.slane %v1410_v38, 4  ;;  %v1426_v48 = vrot.slane %v1424_v41, 5  ;;  %v1429_v49 = vrot.slane %v5858_v40, 4  ;;  %v1433_v50 = vshll.u32 %v4294_v36, 16  ;;  %v4352_v8 = vld [vmem:[%s4248_s17 + $0x24] sm:$0xf] }
  0x43   : > { %v4312_v51 = vsel %vm4298_vm2, %v1403_v43, %v1406_v27  ;;  %v4316_v52 = vsel %vm4298_vm2, %v1383_v44, %v1386_v28  ;;  %v1391_v53 = vrot.slane %v1390_v45, 4  ;;  %v5854_v54 = vshrl.u32 %v4305_v42, 16  ;;  %s320_s17 = sand.u32 1, %s4074_s21  }
  0x44   : > { %5896 = vst [vmem:[#allocation6_spill] sm:$0xff] %v4312_v51  ;;  %5897 = vst [vmem:[#allocation7_spill] sm:$0xff] %v4316_v52  ;;  %v1461_v55 = vshrl.u32 %v4312_v51, 16  ;;  %1773 = vrot.lane.b32.xlu1 %v4312_v51, %s4100_s27  ;;  %1769 = vrot.lane.b32.xlu0 %v4316_v52, %s4100_s27  ;;  %v1460_v57 = vshrl.u32 %v4316_v52, 16  ;;  %v4329_v58 = vsel %vm4298_vm2, %v1411_v47, %v1415_v39  ;;  %v1435_v63 = vrot.slane %v1433_v50, 5 }
  0x45   : > { %5898 = vst [vmem:[#allocation8_spill] sm:$0xff] %v4329_v58  ;;  %v1473_v60 = vshrl.u32 %v4329_v58, 16  ;;  %v4337_v61 = vsel %vm4298_vm2, %v1391_v53, %v1395_v46  ;;  %v1430_v62 = vor.u32 %v1429_v49, %v1426_v48  ;;  %v1418_v5 = vrot.slane %v5854_v54, 4 }
  0x46   : > { %5899 = vst [vmem:[#allocation9_spill] sm:$0xff] %v4337_v61  ;;  %v4339_v0 = vpack.i.b16 %v1461_v55, %v1460_v57  ;;  %v1472_v2 = vshrl.u32 %v4337_v61, 16  ;;  %v1419_v6 = vshll.u32 %v4305_v42, 16  ;;  %v5857_v7 = vshrl.u32 %v4332_v59, 16 }
  0x47   : > { %v1431_v4 = vrot.slane %v1430_v62, 4  ;;  %v1444_v16 = vshll.u32 %v4332_v59, 16  ;;  %v1453_v23 = vshll.u32 %v4345_v3, 16  ;;  %v5853_v25 = vshrl.u32 %v4352_v8, 16 }
  0x48   : > { %1775 = vrot.lane.b32.xlu1 %v4329_v58, %s4100_s27  ;;  %v4356_v14 = vpack.i.b16 %v1473_v60, %v1472_v2  ;;  %1771 = vrot.lane.b32.xlu0 %v4337_v61, %s4100_s27  ;;  %v1421_v18 = vrot.slane %v1419_v6, 5  ;;  %v1449_v22 = vrot.slane %v5857_v7, 4  ;;  %v1439_v28 = vshll.u32 %v4352_v8, 16 }
  0x49   : > { %v4363_v17 = vsel %vm4298_vm2, %v1431_v4, %v1435_v63  ;;  %v1446_v24 = vrot.slane %v1444_v16, 5  ;;  %v1455_v30 = vrot.slane %v1453_v23, 5  ;;  %v1438_v32 = vrot.slane %v5853_v25, 4 }
  0x4a   : > { %5900 = vst [vmem:[#allocation10_spill] sm:$0xff] %v4363_v17  ;;  %v1422_v27 = vor.u32 %v1421_v18, %v1418_v5  ;;  %v1441_v34 = vrot.slane %v1439_v28, 5  ;;  %v1478_v38 = vshrl.u32 %v4363_v17, 16  ;;  %v2434_v37 = vrot.slane %v4251_v9, 5 }
  0x4b   : > { %v1450_v29 = vor.u32 %v1449_v22, %v1446_v24  ;;  %v2437_v60 = vrot.slane %v4282_v26, 5  ;;  %v2441_v62 = vrot.slane %v4264_v12, 5  ;;  %v3719_v2 = vrot.slane %v4254_v10, 9 }
  0x4c   : > { %1779 = vrot.lane.b32.xlu1 %v4363_v17, %s4100_s27  ;;  %v1423_v33 = vrot.slane %v1422_v27, 4  ;;  %v1442_v41 = vor.u32 %v1441_v34, %v1438_v32  ;;  %v2436_v57 = vrot.slane %v2434_v37, 4  ;;  %v2444_v26 = vrot.slane %v4273_v19, 5 }
  0x4d   : > { %v1451_v35 = vrot.slane %v1450_v29, 4  ;;  %v2443_v5 = vrot.slane %v2441_v62, 4  ;;  %v2448_v6 = vrot.slane %v4288_v31, 5  ;;  %v4466_v16 = vsel %vm4445_vm5, %v3719_v2, %v2434_v37 }
  0x4e   : > { %v4377_v39 = vsel %vm4298_vm2, %v1423_v33, %v1426_v48  ;;  %v1443_v46 = vrot.slane %v1442_v41, 4  ;;  %v4456_v4 = vsel %vm4445_vm5, %v2436_v57, %v2437_v60  ;;  %v3720_v18 = vrot.slane %v4257_v11, 9 }
  0x4f   : > { %5901 = vst [vmem:[#allocation11_spill] sm:$0xff] %v4377_v39  ;;  %1777 = vrot.lane.b32.xlu0 %v4377_v39, %s4100_s27  ;;  %v4383_v43 = vsel %vm4298_vm2, %v1451_v35, %v1455_v30  ;;  %v1466_v47 = vshrl.u32 %v4377_v39, 16  ;;  %v4471_v22 = vsel %vm4445_vm5, %v2443_v5, %v2444_v26  ;;  %v2450_v23 = vrot.slane %v2448_v6, 4 }
  0x50   : > { %5902 = vst [vmem:[#allocation12_spill] sm:$0xff] %v4383_v43  ;;  %v1479_v45 = vshrl.u32 %v4383_v43, 16  ;;  %1783 = vrot.lane.b32.xlu1 %v4383_v43, %s4100_s27  ;;  %v4395_v49 = vsel %vm4298_vm2, %v1443_v46, %v1446_v24  ;;  %v2451_v19 = vrot.slane %v4294_v36, 5  ;;  %v2455_v24 = vrot.slane %v4332_v59, 5 }
  0x51   : > { %5903 = vst [vmem:[#allocation13_spill] sm:$0xff] %v4395_v49  ;;  %v1467_v53 = vshrl.u32 %v4395_v49, 16  ;;  %v4481_v27 = vsel %vm4445_vm5, %v3720_v18, %v2441_v62  ;;  %v3721_v28 = vrot.slane %v4305_v42, 9  ;;  %v2458_v36 = vrot.slane %v4345_v3, 5 }
  0x52   : > { %v4391_v48 = vpack.i.b16 %v1479_v45, %v1478_v38  ;;  %v4486_v29 = vsel %vm4445_vm5, %v2450_v23, %v2451_v19  ;;  %v2457_v30 = vrot.slane %v2455_v24, 4  ;;  %v3722_v33 = vrot.slane %v4352_v8, 9 }
  0x53   : > { %1781 = vrot.lane.b32.xlu0 %v4395_v49, %s4100_s27  ;;  %v4404_v55 = vpack.i.b16 %v1467_v53, %v1466_v47  ;;  %v4495_v32 = vsel %vm4445_vm5, %v3721_v28, %v2448_v6  ;;  %v4102_v62 = vmov 1983009808   ;;  %v422_v2 = vlaneseq }
  0x54   : > { %676 = vrot.lane.b32.xlu1 %v4264_v12, %s4100_s27  ;;  %v4500_v34 = vsel %vm4445_vm5, %v2457_v30, %v2458_v36  ;;  %v4508_v3 = vsel %vm4445_vm5, %v3722_v33, %v2455_v24  ;;  %v420_v63 = vunpack.c.l.s4 %v4102_v62  ;;  %v4103_v6 = vmov 1934713408  }
  0x55   : > { %v437_v18 = vunpack.c.l.s4 %v4103_v6  ;;  %v423_v19 = vshrl.u32 %v422_v2, 7 }
  0x56   : > { %v421_v23 = vunpack.c.0.s8 %v420_v63 }
  0x57   : > { %674 = vrot.lane.b32.xlu0 %v4257_v11, %s4100_s27  ;;  %v438_v50 = vunpack.c.0.s8 %v437_v18 }
  0x58   : > { %680 = vrot.lane.b32.xlu1 %v4288_v31, %s4100_s27  ;;  %v4544_v44 = vsub.s32 %v421_v23, %v423_v19 }
  0x5b   : > { %678 = vrot.lane.b32.xlu0 %v4305_v42, %s4100_s27 }
  0x5c   : > { %684 = vrot.lane.b32.xlu1 %v4332_v59, %s4100_s27 }
  0x5f   : > { %682 = vrot.lane.b32.xlu0 %v4352_v8, %s4100_s27 }
  0x60   : > { %2099 = vrot.lane.b32.xlu1 %v4337_v61, %s4101_s6 }
  0x63   : > { %2097 = vrot.lane.b32.xlu0 %v4316_v52, %s4101_s6 }
  0x64   : > { %2103 = vrot.lane.b32.xlu1 %v4329_v58, %s4101_s6 }
  0x67   : > { %2101 = vrot.lane.b32.xlu0 %v4312_v51, %s4101_s6 }
  0x68   : > { %2107 = vrot.lane.b32.xlu1 %v4363_v17, %s4101_s6 }
  0x6b   : > { %2105 = vrot.lane.b32.xlu0 %v4377_v39, %s4101_s6 }
  0x6c   : > { %2111 = vrot.lane.b32.xlu1 %v4383_v43, %s4101_s6 }
  0x6f   : > { %2109 = vrot.lane.b32.xlu0 %v4395_v49, %s4101_s6 }
  0x70   : > { %1048 = vrot.lane.b32.xlu1 %v4251_v9, %s4101_s6 }
  0x73   : > { %1046 = vrot.lane.b32.xlu0 %v4254_v10, %s4101_s6 }
  0x74   : > { %1052 = vrot.lane.b32.xlu1 %v4264_v12, %s4101_s6 }
  0x77   : > { %1050 = vrot.lane.b32.xlu0 %v4257_v11, %s4101_s6 }
  0x78   : > { %1056 = vrot.lane.b32.xlu1 %v4288_v31, %s4101_s6 }
  0x7b   : > { %1054 = vrot.lane.b32.xlu0 %v4305_v42, %s4101_s6 }
  0x7c   : > { %1060 = vrot.lane.b32.xlu1 %v4332_v59, %s4101_s6 }
  0x7f   : > { %1058 = vrot.lane.b32.xlu0 %v4352_v8, %s4101_s6 }
  0x80   : > { %2774 = vrot.lane.b32.xlu1 %v4456_v4, %s4100_s27 }
  0x83   : > { %2772 = vrot.lane.b32.xlu0 %v4466_v16, %s4100_s27 }
  0x84   : > { %2778 = vrot.lane.b32.xlu1 %v4471_v22, %s4100_s27 }
  0x87   : > { %2776 = vrot.lane.b32.xlu0 %v4481_v27, %s4100_s27 }
  0x88   : > { %2782 = vrot.lane.b32.xlu1 %v4486_v29, %s4100_s27 }
  0x8b   : > { %2780 = vrot.lane.b32.xlu0 %v4495_v32, %s4100_s27 }
  0x8c   : > { %2786 = vrot.lane.b32.xlu1 %v4500_v34, %s4100_s27 }
  0x8f   : > { %2784 = vrot.lane.b32.xlu0 %v4508_v3, %s4100_s27  ;;  %s3883_s27 = smul.u32 36, %s320_s17  ;;  %s361_s17 = sand.u32 1, %s4066_s19  }
  0x90   : > { %3102 = vrot.lane.b32.xlu1 %v4456_v4, %s4101_s6 }
  0x91   : > { %s5327_s21 = scalar_lea.vmem [#allocation2], %s3883_s27  ;;  %s3614_s27 = sshll.u32 %s361_s17, 4 }
  0x93   : > { %3100 = vrot.lane.b32.xlu0 %v4466_v16, %s4101_s6 }
  0x94   : > { %3106 = vrot.lane.b32.xlu1 %v4471_v22, %s4101_s6 }
  0x97   : > { %3104 = vrot.lane.b32.xlu0 %v4481_v27, %s4101_s6 }
  0x98   : > { %3110 = vrot.lane.b32.xlu1 %v4486_v29, %s4101_s6 }
  0x9b   : > { %3108 = vrot.lane.b32.xlu0 %v4495_v32, %s4101_s6 }
  0x9c   : > { %3114 = vrot.lane.b32.xlu1 %v4500_v34, %s4101_s6 }
  0x9f   : > { %3112 = vrot.lane.b32.xlu0 %v4508_v3, %s4101_s6  ;;  %s374_s6 = scalar_select %p373_p4, %s4082_s22, 1 }
  0xad   : > { %v673_v35 = vpop.permute.xlu1 %672  ;;  %v671_v38 = vpop.permute.xlu0 %670 }
  0xae   : > { %v701_v30 = vshrl.u32 %v673_v35, 16  ;;  %v689_v15 = vshrl.u32 %v671_v38, 16 }
  0xb6   : > { %v4528_v41 = vpop.permute.xlu1 %1773  ;;  %v4530_v45 = vpop.permute.xlu0 %1769 }
  0xb7   : > { %v1789_v51 = vshrl.u32 %v4528_v41, 16 }
  0xba   : > { %v4532_v46 = vpop.permute.xlu1 %1775  ;;  %v4534_v47 = vpop.permute.xlu0 %1771 }
  0xbe   : > { %v4536_v53 = vpop.permute.xlu1 %1779 }
  0xc1   : > { %v4538_v37 = vpop.permute.xlu0 %1777 }
  0xc2   : > { %v4540_v57 = vpop.permute.xlu1 %1783 }
  0xc5   : > { %v4542_v60 = vpop.permute.xlu0 %1781 }
  0xc6   : > { %v677_v5 = vpop.permute.xlu1 %676  ;;  %v1795_v58 = vshrl.u32 %v4542_v60, 16 }
  0xc7   : > { %v702_v28 = vshrl.u32 %v677_v5, 16  ;;  %v700_v36 = vpack.i.b16 %v677_v5, %v673_v35  ;;  %v4552_v5 = vsub.s32 %v438_v50, %v423_v19 }
  0xc9   : > { %v675_v26 = vpop.permute.xlu0 %674  ;;  %v703_v25 = vpack.i.b16 %v702_v28, %v701_v30  ;;  %v4547_v6 = vrot.slane %v700_v36, %v4544_v44  ;;  %v1793_v30 = vpack.i.b16 %v4542_v60, %v4538_v37 }
  0xca   : > { %v681_v24 = vpop.permute.xlu1 %680  ;;  %v690_v1 = vshrl.u32 %v675_v26, 16  ;;  %v688_v7 = vpack.i.b16 %v675_v26, %v671_v38  ;;  %v1799_v26 = vpack.i.b16 %v4532_v46, %v4534_v47 }
  0xcb   : > { %v707_v54 = vshrl.u32 %v681_v24, 16  ;;  %v4559_v38 = vrot.slane %v703_v25, %v4544_v44 }
  0xcc   : > { %v691_v18 = vpack.i.b16 %v690_v1, %v689_v15  ;;  %v4567_v50 = vrot.slane %v688_v7, %v4544_v44 }
  0xcd   : > { %v679_v33 = vpop.permute.xlu0 %678 }
  0xce   : > { %v685_v56 = vpop.permute.xlu1 %684  ;;  %v695_v23 = vshrl.u32 %v679_v33, 16  ;;  %v4584_v7 = vrot.slane %v691_v18, %v4544_v44 }
  0xcf   : > { %v706_v62 = vpack.i.b16 %v685_v56, %v681_v24  ;;  %v708_v13 = vshrl.u32 %v685_v56, 16  ;;  %v1805_v56 = vpack.i.b16 %v4540_v57, %v4536_v53 }
  0xd1   : > { %v709_v63 = vpack.i.b16 %v708_v13, %v707_v54  ;;  %v4550_v2 = vrot.slane %v706_v62, %v4544_v44  ;;  %v683_v35 = vpop.permute.xlu0 %682 }
  0xd2   : > { %v694_v40 = vpack.i.b16 %v683_v35, %v679_v33  ;;  %v696_v20 = vshrl.u32 %v683_v35, 16  ;;  %v4554_v28 = vpop.permute.xlu1 %2099  ;;  %v1892_v33 = vrot.slane %v1805_v56, %v4544_v44  ;;  %v1787_v35 = vpack.i.b16 %v4528_v41, %v4530_v45 }
  0xd3   : > { %v794_v13 = vcombine.low %v4547_v6, %v4550_v2  ;;  %v4564_v54 = vrot.slane %v709_v63, %v4544_v44  ;;  %v1824_v56 = vrot.slane %v1793_v30, %v4544_v44  ;;  %v1807_v30 = vshrl.u32 %v4540_v57, 16 }
  0xd4   : > { %v697_v15 = vpack.i.b16 %v696_v20, %v695_v23  ;;  %v4570_v1 = vrot.slane %v694_v40, %v4544_v44  ;;  %v1816_v49 = vrot.slane %v1787_v35, %v4544_v44  ;;  %v1806_v57 = vshrl.u32 %v4536_v53, 16 }
  0xd5   : > { %v4574_v19 = vpop.permute.xlu0 %2097  ;;  %v4577_v25 = vrot.slane %v794_v13, %v4552_v5  ;;  %v828_v24 = vcombine.low %v4559_v38, %v4564_v54  ;;  %v1884_v13 = vrot.slane %v1799_v26, %v4544_v44 }
  0xd6   : > { %v726_v20 = vcombine.low %v4567_v50, %v4570_v1  ;;  %v4589_v40 = vrot.slane %v697_v15, %v4544_v44  ;;  %v4591_v36 = vpop.permute.xlu1 %2103 }
  0xd7   : > { %5906 = vst [vmem:[#allocation14_spill] sm:$0xff] %v4577_v25  ;;  %v3792_v62 = vcombine.high %v4577_v25, %v4577_v25  ;;  %v836_v63 = vrot.slane %v828_v24, %v4552_v5  ;;  %v1893_v25 = vcombine.low %v1884_v13, %v1892_v33  ;;  %v1894_v43 = vcombine.high %v1884_v13, %v1892_v33 }
  0xd8   : > { %v4600_v18 = vrot.slane %v726_v20, %v4552_v5  ;;  %v760_v23 = vcombine.low %v4584_v7, %v4589_v40  ;;  %v2127_v33 = vpack.i.b16 %v4591_v36, %v4554_v28 }
  0xd9   : > { %v4605_v15 = vpop.permute.xlu0 %2101  ;;  %889 = vrot.lane.b32.xlu1 %v3792_v62, %s4104_s7  ;;  %v3639_v39 = vcombine.low %v836_v63, %v836_v63  ;;  %v1825_v62 = vcombine.low %v1816_v49, %v1824_v56  ;;  %v3793_v61 = vcombine.high %v836_v63, %v836_v63  ;;  %v4625_v35 = vrot.slane %v1893_v25, %v4552_v5 }
  0xda   : > { %5907 = vst [vmem:[#allocation15_spill] sm:$0xff] %v4600_v18  ;;  %v3788_v24 = vcombine.high %v4600_v18, %v4600_v18  ;;  %v4611_v21 = vpop.permute.xlu1 %2107  ;;  %v768_v20 = vrot.slane %v760_v23, %v4552_v5  ;;  %v1826_v25 = vcombine.high %v1816_v49, %v1824_v56  ;;  %v1908_v52 = vrot.slane %v1894_v43, %v4552_v5 }
  0xdb   : > { %v3816_v60 = vcombine.high %v4625_v35, %v4625_v35  ;;  %v1794_v49 = vshrl.u32 %v4538_v37, 16  ;;  %v2115_v56 = vpack.i.b16 %v4605_v15, %v4574_v19 }
  0xdc   : > { %854 = vrot.lane.b32.xlu0 %v3788_v24, %s4104_s7  ;;  %v3632_v17 = vcombine.low %v768_v20, %v768_v20  ;;  %v1801_v24 = vshrl.u32 %v4532_v46, 16  ;;  %v3789_v63 = vcombine.high %v768_v20, %v768_v20 }
  0xdd   : > { %v4616_v26 = vpop.permute.xlu0 %2105  ;;  %884 = vrot.lane.b32.xlu1 %v3639_v39, %s4105_s28  ;;  %v1800_v39 = vshrl.u32 %v4534_v47, 16  ;;  %v1808_v47 = vpack.i.b16 %v1807_v30, %v1806_v57  ;;  %v4655_v30 = vrot.slane %v2127_v33, %v4544_v44  ;;  %v4668_v57 = vrot.slane %v2115_v56, %v4544_v44 }
  0xde   : > { %v4620_v18 = vpop.permute.xlu1 %2111 }
  0xdf   : > { %v2133_v23 = vpack.i.b16 %v4620_v18, %v4611_v21  ;;  %v1802_v20 = vpack.i.b16 %v1801_v24, %v1800_v39  ;;  %v1926_v37 = vrot.slane %v1808_v47, %v4544_v44  ;;  %v3695_v24 = vcombine.low %v1908_v52, %v1908_v52 }
  0xe0   : > { %849 = vrot.lane.b32.xlu0 %v3632_v17, %s4105_s28  ;;  %v4640_v17 = vrot.slane %v1825_v62, %v4552_v5  ;;  %v1796_v62 = vpack.i.b16 %v1795_v58, %v1794_v49 }
  0xe1   : > { %v4634_v13 = vpop.permute.xlu0 %2109  ;;  %894 = vrot.lane.b32.xlu1 %v3793_v61, %s4106_s9  ;;  %v4643_v53 = vrot.slane %v2133_v23, %v4544_v44  ;;  %v1788_v61 = vshrl.u32 %v4530_v45, 16  ;;  %v1840_v45 = vrot.slane %v1826_v25, %v4552_v5  ;;  %v1918_v58 = vrot.slane %v1802_v20, %v4544_v44 }
  0xe2   : > { %v2121_v46 = vpack.i.b16 %v4634_v13, %v4616_v26  ;;  %v3812_v41 = vcombine.high %v4640_v17, %v4640_v17  ;;  %v1858_v33 = vrot.slane %v1796_v62, %v4544_v44  ;;  %v2134_v20 = vshrl.u32 %v4611_v21, 16 }
  0xe3   : > { %v2221_v23 = vcombine.low %v4655_v30, %v4643_v53  ;;  %v1790_v39 = vpack.i.b16 %v1789_v51, %v1788_v61  ;;  %v1927_v51 = vcombine.low %v1918_v58, %v1926_v37  ;;  %v3814_v61 = vcombine.high %v1840_v45, %v1840_v45 }
  0xe4   : > { %859 = vrot.lane.b32.xlu0 %v3789_v63, %s4106_s9  ;;  %v4659_v43 = vrot.slane %v2121_v46, %v4544_v44  ;;  %v3688_v46 = vcombine.low %v1840_v45, %v1840_v45  ;;  %v3818_v63 = vcombine.high %v1908_v52, %v1908_v52  ;;  %v2135_v52 = vshrl.u32 %v4620_v18, 16 }
  0xe5   : > { %1988 = vrot.lane.b32.xlu1 %v3816_v60, %s4104_s7  ;;  %v4677_v47 = vrot.slane %v2221_v23, %v4552_v5  ;;  %v1850_v60 = vrot.slane %v1790_v39, %v4544_v44  ;;  %v2128_v23 = vshrl.u32 %v4554_v28, 16  ;;  %v2122_v45 = vshrl.u32 %v4616_v26, 16 }
  0xe6   : > { %v2153_v25 = vcombine.low %v4668_v57, %v4659_v43  ;;  %v2123_v39 = vshrl.u32 %v4634_v13, 16  ;;  %v2117_v28 = vshrl.u32 %v4605_v15, 16 }
  0xe7   : > { %5908 = vst [vmem:[#allocation16_spill] sm:$0xff] %v4677_v47  ;;  %v1859_v56 = vcombine.low %v1850_v60, %v1858_v33  ;;  %v3824_v62 = vcombine.high %v4677_v47, %v4677_v47  ;;  %v1860_v13 = vcombine.high %v1850_v60, %v1858_v33 }
  0xe8   : > { %1953 = vrot.lane.b32.xlu0 %v3812_v41, %s4104_s7  ;;  %v4683_v49 = vrot.slane %v2153_v25, %v4552_v5  ;;  %v1935_v41 = vrot.slane %v1927_v51, %v4552_v5  ;;  %v2136_v25 = vpack.i.b16 %v2135_v52, %v2134_v20  ;;  %v2116_v51 = vshrl.u32 %v4574_v19, 16 }
  0xe9   : > { %1998 = vrot.lane.b32.xlu1 %v3695_v24, %s4107_s8  ;;  %v2129_v24 = vshrl.u32 %v4591_v36, 16  ;;  %v1867_v18 = vrot.slane %v1859_v56, %v4552_v5  ;;  %v2124_v26 = vpack.i.b16 %v2123_v39, %v2122_v45 }
  0xea   : > { %5909 = vst [vmem:[#allocation17_spill] sm:$0xff] %v4683_v49  ;;  %v3820_v21 = vcombine.high %v4683_v49, %v4683_v49  ;;  %v3817_v49 = vcombine.high %v1935_v41, %v1935_v41  ;;  %v2118_v20 = vpack.i.b16 %v2117_v28, %v2116_v51  ;;  %v2222_v51 = vcombine.high %v4655_v30, %v4643_v53 }
  0xeb   : > { %v2130_v36 = vpack.i.b16 %v2129_v24, %v2128_v23  ;;  %v2186_v15 = vrot.slane %v2124_v26, %v4544_v44  ;;  %v829_v30 = vcombine.high %v4559_v38, %v4564_v54 }
  0xec   : > { %1963 = vrot.lane.b32.xlu0 %v3688_v46, %s4107_s8  ;;  %v3692_v46 = vcombine.low %v1935_v41, %v1935_v41  ;;  %v2178_v33 = vrot.slane %v2118_v20, %v4544_v44 }
  0xed   : > { %2008 = vrot.lane.b32.xlu1 %v3818_v63, %s4108_s11  ;;  %v1928_v63 = vcombine.high %v1918_v58, %v1926_v37  ;;  %v2246_v19 = vrot.slane %v2130_v36, %v4544_v44  ;;  %v3813_v37 = vcombine.high %v1867_v18, %v1867_v18  ;;  %v1874_v58 = vrot.slane %v1860_v13, %v4552_v5 }
  0xee   : > { %v2187_v41 = vcombine.low %v2178_v33, %v2186_v15  ;;  %v4758_v38 = vrot.slane %v829_v30, %v4552_v5 }
  0xef   : > { %v1942_v56 = vrot.slane %v1928_v63, %v4552_v5  ;;  %v3689_v60 = vcombine.low %v1874_v58, %v1874_v58 }
  0xf0   : > { %1973 = vrot.lane.b32.xlu0 %v3814_v61, %s4108_s11  ;;  %v3685_v61 = vcombine.low %v1867_v18, %v1867_v18  ;;  %v2195_v39 = vrot.slane %v2187_v41, %v4552_v5  ;;  %v5910_v41 = vshrl.u32 %v4251_v9, 16 }
  0xf1   : > { %2316 = vrot.lane.b32.xlu1 %v3824_v62, %s4104_s7  ;;  %v2254_v62 = vrot.slane %v2136_v25, %v4544_v44  ;;  %v3696_v52 = vcombine.low %v1942_v56, %v1942_v56  ;;  %v3819_v24 = vcombine.high %v1942_v56, %v1942_v56  ;;  %v4721_v25 = vpop.permute.xlu1 %1048  ;;  %v761_v56 = vcombine.high %v4584_v7, %v4589_v40 }
  0xf2   : > { %v3702_v63 = vcombine.low %v2195_v39, %v2195_v39  ;;  %v3821_v26 = vcombine.high %v2195_v39, %v2195_v39  ;;  %v2188_v7 = vcombine.high %v2178_v33, %v2186_v15  ;;  %v3643_v40 = vcombine.low %v4758_v38, %v4758_v38 }
  0xf3   : > { %v2255_v23 = vcombine.low %v2246_v19, %v2254_v62  ;;  %v2256_v54 = vcombine.high %v2246_v19, %v2254_v62  ;;  %v5913_v39 = vshrl.u32 %v4332_v59, 16 }
  0xf4   : > { %2281 = vrot.lane.b32.xlu0 %v3820_v21, %s4104_s7  ;;  %v795_v21 = vcombine.high %v4547_v6, %v4550_v2  ;;  %v4729_v6 = vpop.permute.xlu0 %1046  ;;  %v2154_v2 = vcombine.high %v4668_v57, %v4659_v43 }
  0xf5   : > { %1983 = vrot.lane.b32.xlu1 %v3692_v46, %s4105_s28  ;;  %v2263_v45 = vrot.slane %v2255_v23, %v4552_v5  ;;  %v727_v46 = vcombine.high %v4567_v50, %v4570_v1  ;;  %v4738_v1 = vrot.slane %v2222_v51, %v4552_v5  ;;  %v4740_v53 = vpop.permute.xlu1 %1052  ;;  %v4772_v23 = vrot.slane %v2256_v54, %v4552_v5 }
  0xf6   : > { %v809_v36 = vrot.slane %v795_v21, %v4552_v5  ;;  %v4749_v57 = vrot.slane %v2154_v2, %v4552_v5  ;;  %v2463_v51 = vshrl.u32 %v4466_v16, 16  ;;  %v2481_v2 = vshrl.u32 %v4486_v29, 16 }
  0xf7   : > { %v3709_v18 = vcombine.low %v2263_v45, %v2263_v45  ;;  %v3825_v28 = vcombine.high %v2263_v45, %v2263_v45  ;;  %v3712_v20 = vcombine.low %v4738_v1, %v4738_v1  ;;  %v3713_v15 = vcombine.low %v4772_v23, %v4772_v23 }
  0xf8   : > { %1948 = vrot.lane.b32.xlu0 %v3685_v61, %s4105_s28  ;;  %v4735_v61 = vrot.slane %v727_v46, %v4552_v5  ;;  %v3642_v50 = vcombine.low %v809_v36, %v809_v36  ;;  %v4751_v13 = vpop.permute.xlu0 %1050  ;;  %v2475_v46 = vshrl.u32 %v4456_v4, 16 }
  0xf9   : > { %1993 = vrot.lane.b32.xlu1 %v3817_v49, %s4106_s9  ;;  %v3815_v49 = vcombine.high %v1874_v58, %v1874_v58  ;;  %v3705_v58 = vcombine.low %v4749_v57, %v4749_v57 }
  0xfa   : > { %v3635_v43 = vcombine.low %v4735_v61, %v4735_v61 }
  0xfc   : > { %1958 = vrot.lane.b32.xlu0 %v3813_v37, %s4106_s9  ;;  %v4762_v37 = vpop.permute.xlu1 %1056  ;;  %v4775_v62 = vpop.permute.xlu0 %1054 }
  0xfd   : > { %2003 = vrot.lane.b32.xlu1 %v3696_v52, %s4109_s12  ;;  %v4767_v52 = vrot.slane %v761_v56, %v4552_v5  ;;  %v5914_v56 = vshrl.u32 %v4254_v10, 16 }
  0xff   : > { %v3636_v19 = vcombine.low %v4767_v52, %v4767_v52 }
 0x100   : > { %1968 = vrot.lane.b32.xlu0 %v3689_v60, %s4109_s12  ;;  %v4781_v60 = vrot.slane %v2188_v7, %v4552_v5  ;;  %v4785_v33 = vpop.permute.xlu1 %1060 }
 0x101   : > { %2013 = vrot.lane.b32.xlu1 %v3819_v24, %s4110_s16  ;;  %v5911_v24 = vshrl.u32 %v4264_v12, 16 }
 0x102   : > { %v3706_v30 = vcombine.low %v4781_v60, %v4781_v60 }
 0x103   : > { %v411_v45 = vpack.i.b16 %v5911_v24, %v5910_v41  ;;  %v4829_v24 = vrot.slane %v4356_v14, %v4544_v44 }
 0x104   : > { %1978 = vrot.lane.b32.xlu0 %v3815_v49, %s4110_s16  ;;  %v5912_v49 = vshrl.u32 %v4288_v31, 16  ;;  %v4847_v14 = vpop.permute.xlu1 %2774 }
 0x105   : > { %2311 = vrot.lane.b32.xlu1 %v3709_v18, %s4105_s28  ;;  %v4797_v18 = vrot.slane %v4339_v0, %v4544_v44  ;;  %v2470_v0 = vshrl.u32 %v4508_v3, 16  ;;  %v4818_v7 = vrot.slane %v411_v45, %v4544_v44 }
 0x106   : > { %v417_v21 = vpack.i.b16 %v5913_v39, %v5912_v49  ;;  %v4833_v49 = vrot.slane %v4391_v48, %v4544_v44  ;;  %v5919_v39 = vld [vmem:[#allocation6_spill] sm:$0xff]  ;;  %v5923_v48 = vld [vmem:[#allocation8_spill] sm:$0xff] }
 0x108   : > { %2276 = vrot.lane.b32.xlu0 %v3702_v63, %s4105_s28  ;;  %v2476_v63 = vshrl.u32 %v4471_v22, 16 }
 0x109   : > { %2321 = vrot.lane.b32.xlu1 %v3825_v28, %s4106_s9  ;;  %v2464_v28 = vshrl.u32 %v4481_v27, 16 }
 0x10a   : > { %v2477_v45 = vpack.i.b16 %v2476_v63, %v2475_v46 }
 0x10b   : > { %v2465_v46 = vpack.i.b16 %v2464_v28, %v2463_v51 }
 0x10c   : > { %2286 = vrot.lane.b32.xlu0 %v3821_v26, %s4106_s9  ;;  %v2482_v26 = vshrl.u32 %v4500_v34, 16  ;;  %v4871_v51 = vrot.slane %v2477_v45, %v4544_v44  ;;  %v5928_v45 = vld [vmem:[#allocation10_spill] sm:$0xff] }
 0x10d   : > { %899 = vrot.lane.b32.xlu1 %v3642_v50, %s4107_s8  ;;  %v2469_v50 = vshrl.u32 %v4495_v32, 16 }
 0x10f   : > { %v2471_v63 = vpack.i.b16 %v2470_v0, %v2469_v50  ;;  %v408_v50 = vpack.i.b16 %v4264_v12, %v4251_v9  ;;  %v414_v0 = vpack.i.b16 %v4332_v59, %v4288_v31  ;;  %v5931_v9 = vld [vmem:[#allocation13_spill] sm:$0xff]  ;;  %v5932_v12 = vld [vmem:[#allocation11_spill] sm:$0xff] }
 0x110   : > { %864 = vrot.lane.b32.xlu0 %v3635_v43, %s4107_s8  ;;  %v4811_v43 = vpop.permute.xlu0 %1058  ;;  %v5933_v31 = vpack.i.b16 %v5931_v9, %v5932_v12  ;;  %v3823_v9 = vcombine.high %v4781_v60, %v4781_v60 }
 0x111   : > { %2326 = vrot.lane.b32.xlu1 %v3712_v20, %s4107_s8  ;;  %v5915_v20 = vshrl.u32 %v4257_v11, 16 }
 0x112   : > { %v4902_v59 = vrot.slane %v5933_v31, %v4544_v44 }
 0x113   : > { %v399_v54 = vpack.i.b16 %v5915_v20, %v5914_v56 }
 0x114   : > { %2291 = vrot.lane.b32.xlu0 %v3705_v58, %s4107_s8  ;;  %v3794_v58 = vcombine.high %v809_v36, %v809_v36  ;;  %v4837_v36 = vrot.slane %v4404_v55, %v4544_v44 }
 0x115   : > { %904 = vrot.lane.b32.xlu1 %v3643_v40, %s4109_s12  ;;  %v4821_v40 = vrot.slane %v417_v21, %v4544_v44  ;;  %v5920_v21 = vld [vmem:[#allocation7_spill] sm:$0xff] }
 0x116   : > { %5918 = vst [vmem:[#allocation18_spill] sm:$0xff] %v4837_v36  ;;  %v5921_v56 = vpack.i.b16 %v5919_v39, %v5920_v21  ;;  %v3826_v39 = vcombine.high %v4738_v1, %v4738_v1 }
 0x118   : > { %869 = vrot.lane.b32.xlu0 %v3636_v19, %s4109_s12  ;;  %v5916_v19 = vshrl.u32 %v4305_v42, 16  ;;  %v4844_v20 = vrot.slane %v5921_v56, %v4544_v44 }
 0x119   : > { %2331 = vrot.lane.b32.xlu1 %v3713_v15, %s4109_s12  ;;  %v5917_v15 = vshrl.u32 %v4352_v8, 16 }
 0x11a   : > { %5922 = vst [vmem:[#allocation6_spill] sm:$0xff] %v4844_v20 }
 0x11b   : > { %v405_v41 = vpack.i.b16 %v5917_v15, %v5916_v19  ;;  %v2483_v19 = vpack.i.b16 %v2482_v26, %v2481_v2  ;;  %v5924_v15 = vld [vmem:[#allocation9_spill] sm:$0xff]  ;;  %v536_v2 = vcombine.low %v4818_v7, %v4821_v40  ;;  %v4862_v26 = vrot.slane %v399_v54, %v4544_v44 }
 0x11c   : > { %2296 = vrot.lane.b32.xlu0 %v3706_v30, %s4109_s12  ;;  %v5925_v47 = vpack.i.b16 %v5923_v48, %v5924_v15  ;;  %v3790_v30 = vcombine.high %v4735_v61, %v4735_v61  ;;  %v5873_v54 = vmov 0   ;;  %v2474_v48 = vpack.i.b16 %v4471_v22, %v4456_v4  ;;  %5934 = vst [vmem:[#allocation9_spill] sm:$0xff] %v4902_v59 }
 0x11d   : > { %909 = vrot.lane.b32.xlu1 %v3794_v58, %s4108_s11  ;;  %v4865_v58 = vrot.slane %v405_v41, %v4544_v44  ;;  %v4879_v28 = vrot.slane %v2483_v19, %v4544_v44  ;;  %2086 = vmatprep.mubr.bf16.mxu0 %v5873_v54  ;;  %v5927_v41 = vld [vmem:[#allocation12_spill] sm:$0xff]  ;;  %v3822_v19 = vcombine.high %v4749_v57, %v4749_v57 }
 0x11e   : > { %v4853_v55 = vrot.slane %v5925_v47, %v4544_v44  ;;  %v4868_v47 = vpop.permute.xlu0 %2772  ;;  %v5929_v21 = vpack.i.b16 %v5927_v41, %v5928_v45  ;;  %989 = vmatprep.mubr.bf16.mxu1 %v5873_v54  ;;  %3984 = vset.pattern.permute.xlu0 %v5873_v54  ;;  %v2480_v15 = vpack.i.b16 %v4500_v34, %v4486_v29 }
 0x11f   : > { %v3795_v4 = vcombine.high %v4758_v38, %v4758_v38  ;;  %v468_v22 = vcombine.low %v4862_v26, %v4865_v58  ;;  %3985 = vset.pattern.permute.xlu1 %v5873_v54  ;;  %v4915_v57 = vrot.slane %v2465_v46, %v4544_v44  ;;  %v396_v29 = vpack.i.b16 %v4257_v11, %v4254_v10 }
 0x120   : > { %5926 = vst [vmem:[#allocation7_spill] sm:$0xff] %v4853_v55  ;;  %874 = vrot.lane.b32.xlu0 %v3790_v30, %s4108_s11  ;;  %v4890_v56 = vrot.slane %v5929_v21, %v4544_v44  ;;  %v4906_v30 = vpop.permute.xlu1 %2778  ;;  %v402_v34 = vpack.i.b16 %v4352_v8, %v4305_v42  ;;  %v544_v38 = vrot.slane %v536_v2, %v4552_v5 }
 0x121   : > { %2336 = vrot.lane.b32.xlu1 %v3826_v39, %s4108_s11  ;;  %v4918_v39 = vrot.slane %v2471_v63, %v4544_v44  ;;  %v2602_v41 = vcombine.low %v4871_v51, %v4879_v28  ;;  %v4929_v45 = vrot.slane %v408_v50, %v4544_v44  ;;  %v501_v46 = vrot.slane %v414_v0, %v4544_v44 }
 0x122   : > { %5930 = vst [vmem:[#allocation8_spill] sm:$0xff] %v4890_v56  ;;  %v4933_v63 = vrot.slane %v2474_v48, %v4544_v44  ;;  %v2462_v10 = vpack.i.b16 %v4481_v27, %v4466_v16  ;;  %v4937_v11 = vpop.permute.xlu0 %2776  ;;  %v3791_v42 = vcombine.high %v4767_v52, %v4767_v52  ;;  %v2468_v8 = vpack.i.b16 %v4508_v3, %v4495_v32 }
 0x123   : > { %v3827_v2 = vcombine.high %v4772_v23, %v4772_v23  ;;  %v476_v16 = vrot.slane %v468_v22, %v4552_v5  ;;  %v2534_v27 = vcombine.low %v4915_v57, %v4918_v39  ;;  %v425_v52 = vrot.slane %v396_v29, %v4544_v44 }
 0x124   : > { %2301 = vrot.lane.b32.xlu0 %v3822_v19, %s4108_s11  ;;  %v433_v32 = vrot.slane %v402_v34, %v4544_v44  ;;  %v2567_v3 = vrot.slane %v2480_v15, %v4544_v44  ;;  %v4956_v23 = vpop.permute.xlu1 %2782  ;;  %v3625_v21 = vcombine.low %v544_v38, %v544_v38  ;;  %v2610_v48 = vrot.slane %v2602_v41, %v4552_v5 }
 0x125   : > { %914 = vrot.lane.b32.xlu1 %v3795_v4, %s4110_s16  ;;  %v502_v19 = vcombine.low %v4929_v45, %v501_v46  ;;  %v2491_v12 = vrot.slane %v2462_v10, %v4544_v44  ;;  %v2499_v31 = vrot.slane %v2468_v8, %v4544_v44  ;;  %v3618_v15 = vcombine.low %v476_v16, %v476_v16 }
 0x126   : > { %v4965_v4 = vpop.permute.xlu0 %2780  ;;  %v2542_v22 = vrot.slane %v2534_v27, %v4552_v5  ;;  %v434_v29 = vcombine.low %v425_v52, %v433_v32  ;;  %v3730_v34 = vcombine.low %v2610_v48, %v2610_v48  ;;  %v2568_v60 = vcombine.low %v4933_v63, %v2567_v3 }
 0x127   : > { %v4971_v41 = vrot.slane %v502_v19, %v4552_v5  ;;  %v3785_v50 = vcombine.high %v544_v38, %v544_v38  ;;  %v435_v61 = vcombine.high %v425_v52, %v433_v32  ;;  %v3833_v0 = vcombine.high %v2610_v48, %v2610_v48 }
 0x128   : > { %879 = vrot.lane.b32.xlu0 %v3791_v42, %s4110_s16  ;;  %v4974_v42 = vpop.permute.xlu1 %2786  ;;  %v3723_v10 = vcombine.low %v2542_v22, %v2542_v22  ;;  %v4978_v8 = vrot.slane %v434_v29, %v4552_v5  ;;  %v2797_v56 = vshrl.u32 %v4965_v4, 16 }
 0x129   : > { %2341 = vrot.lane.b32.xlu1 %v3827_v2, %s4110_s16  ;;  %5935 = vst [vmem:[#allocation12_spill] sm:$0xff] %v4971_v41  ;;  %v2500_v2 = vcombine.low %v2491_v12, %v2499_v31  ;;  %v3784_v27 = vcombine.high %v4971_v41, %v4971_v41  ;;  %v2809_v41 = vshrl.u32 %v4956_v23, 16  ;;  %v2810_v59 = vshrl.u32 %v4974_v42, 16 }
 0x12a   : > { %5936 = vst [vmem:[#allocation10_spill] sm:$0xff] %v4978_v8  ;;  %v4986_v19 = vpop.permute.xlu0 %2784 }
 0x12b   : > { %v2798_v55 = vshrl.u32 %v4986_v19, 16 }
 0x12c   : > { %2306 = vrot.lane.b32.xlu0 %v3823_v9, %s4110_s16  ;;  %v3780_v9 = vcombine.high %v4978_v8, %v4978_v8  ;;  %v4994_v29 = vpop.permute.xlu1 %3102  ;;  %v2804_v8 = vshrl.u32 %v4906_v30, 16 }
 0x12d   : > { %592 = vrot.lane.b32.xlu1 %v3625_v21, %s4105_s28  ;;  %v4984_v21 = vrot.slane %v2568_v60, %v4552_v5  ;;  %v3781_v60 = vcombine.high %v476_v16, %v476_v16  ;;  %v5026_v16 = vrot.slane %v435_v61, %v4552_v5 }
 0x12f   : > { %5937 = vst [vmem:[#allocation13_spill] sm:$0xff] %v4984_v21  ;;  %v3621_v61 = vcombine.low %v5026_v16, %v5026_v16 }
 0x130   : > { %557 = vrot.lane.b32.xlu0 %v3618_v15, %s4105_s28  ;;  %v4992_v15 = vrot.slane %v2500_v2, %v4552_v5  ;;  %v5010_v1 = vpop.permute.xlu1 %3106 }
 0x131   : > { %2658 = vrot.lane.b32.xlu1 %v3730_v34, %s4105_s28  ;;  %v3832_v34 = vcombine.high %v4984_v21, %v4984_v21 }
 0x132   : > { %5938 = vst [vmem:[#allocation11_spill] sm:$0xff] %v4992_v15  ;;  %v3828_v2 = vcombine.high %v4992_v15, %v4992_v15 }
 0x134   : > { %2623 = vrot.lane.b32.xlu0 %v3723_v10, %s4105_s28  ;;  %v5003_v10 = vpop.permute.xlu0 %3100  ;;  %v5028_v52 = vpop.permute.xlu1 %3110 }
 0x135   : > { %597 = vrot.lane.b32.xlu1 %v3784_v27, %s4104_s7  ;;  %v503_v27 = vcombine.high %v4929_v45, %v501_v46  ;;  %v3829_v46 = vcombine.high %v2542_v22, %v2542_v22 }
 0x137   : > { %v5015_v54 = vrot.slane %v503_v27, %v4552_v5 }
 0x138   : > { %562 = vrot.lane.b32.xlu0 %v3780_v9, %s4104_s7  ;;  %v2569_v9 = vcombine.high %v4933_v63, %v2567_v3  ;;  %v5018_v15 = vpop.permute.xlu0 %3104  ;;  %v537_v3 = vcombine.high %v4818_v7, %v4821_v40  ;;  %v2603_v40 = vcombine.high %v4871_v51, %v4879_v28  ;;  %v5056_v22 = vpop.permute.xlu1 %3114 }
 0x139   : > { %2663 = vrot.lane.b32.xlu1 %v3832_v34, %s4104_s7  ;;  %v3628_v63 = vcombine.low %v5015_v54, %v5015_v54 }
 0x13a   : > { %v5034_v32 = vrot.slane %v2569_v9, %v4552_v5  ;;  %v5052_v7 = vrot.slane %v537_v3, %v4552_v5  ;;  %v5070_v51 = vrot.slane %v2603_v40, %v4552_v5  ;;  %v1066_v40 = vshrl.u32 %v4751_v13, 16 }
 0x13c   : > { %2628 = vrot.lane.b32.xlu0 %v3828_v2, %s4104_s7  ;;  %v5038_v48 = vpop.permute.xlu0 %3108 }
 0x13d   : > { %602 = vrot.lane.b32.xlu1 %v3785_v50, %s4106_s9  ;;  %v2501_v50 = vcombine.high %v2491_v12, %v2499_v31  ;;  %v3733_v31 = vcombine.low %v5034_v32, %v5034_v32 }
 0x13f   : > { %v5044_v12 = vrot.slane %v2501_v50, %v4552_v5  ;;  %v1083_v50 = vshrl.u32 %v4762_v37, 16 }
 0x140   : > { %567 = vrot.lane.b32.xlu0 %v3781_v60, %s4106_s9  ;;  %v3629_v60 = vcombine.low %v5052_v7, %v5052_v7  ;;  %v5072_v28 = vpop.permute.xlu0 %3112 }
 0x141   : > { %2668 = vrot.lane.b32.xlu1 %v3833_v0, %s4106_s9  ;;  %v469_v0 = vcombine.high %v4862_v26, %v4865_v58  ;;  %v3726_v34 = vcombine.low %v5044_v12, %v5044_v12  ;;  %v2535_v58 = vcombine.high %v4915_v57, %v4918_v39  ;;  %v3734_v57 = vcombine.low %v5070_v51, %v5070_v51 }
 0x142   : > { %v1077_v39 = vshrl.u32 %v4721_v25, 16 }
 0x143   : > { %v5062_v26 = vrot.slane %v469_v0, %v4552_v5  ;;  %v5080_v9 = vrot.slane %v2535_v58, %v4552_v5  ;;  %v1065_v0 = vshrl.u32 %v4729_v6, 16  ;;  %v1072_v58 = vshrl.u32 %v4811_v43, 16 }
 0x144   : > { %2633 = vrot.lane.b32.xlu0 %v3829_v46, %s4106_s9  ;;  %v1078_v46 = vshrl.u32 %v4740_v53, 16 }
 0x145   : > { %607 = vrot.lane.b32.xlu1 %v3628_v63, %s4107_s8  ;;  %v3622_v27 = vcombine.low %v5062_v26, %v5062_v26  ;;  %v1084_v63 = vshrl.u32 %v4785_v33, 16 }
 0x146   : > { %v1079_v45 = vpack.i.b16 %v1078_v46, %v1077_v39  ;;  %v3834_v46 = vcombine.high %v5034_v32, %v5034_v32  ;;  %v1076_v32 = vpack.i.b16 %v4740_v53, %v4721_v25  ;;  %v2799_v53 = vpack.i.b16 %v2798_v55, %v2797_v56 }
 0x147   : > { %v1085_v38 = vpack.i.b16 %v1084_v63, %v1083_v50  ;;  %v2791_v50 = vshrl.u32 %v4868_v47, 16  ;;  %v2792_v63 = vshrl.u32 %v4937_v11, 16  ;;  %v3783_v55 = vcombine.high %v5062_v26, %v5062_v26 }
 0x148   : > { %572 = vrot.lane.b32.xlu0 %v3621_v61, %s4107_s8  ;;  %v1064_v56 = vpack.i.b16 %v4751_v13, %v4729_v6  ;;  %v5181_v26 = vrot.slane %v2799_v53, %v4544_v44  ;;  %v2802_v13 = vpack.i.b16 %v4906_v30, %v4847_v14 }
 0x149   : > { %2673 = vrot.lane.b32.xlu1 %v3733_v31, %s4107_s8  ;;  %v3727_v31 = vcombine.low %v5080_v9, %v5080_v9  ;;  %v2793_v25 = vpack.i.b16 %v2792_v63, %v2791_v50  ;;  %v3831_v63 = vcombine.high %v5080_v9, %v5080_v9 }
 0x14b   : > { %v5074_v2 = vpop.permute.xlu1 %889 }
 0x14c   : > { %2638 = vrot.lane.b32.xlu0 %v3726_v34, %s4107_s8  ;;  %v1071_v34 = vshrl.u32 %v4775_v62, 16 }
 0x14d   : > { %612 = vrot.lane.b32.xlu1 %v3629_v60, %s4109_s12  ;;  %v3786_v60 = vcombine.high %v5015_v54, %v5015_v54  ;;  %v1067_v54 = vpack.i.b16 %v1066_v40, %v1065_v0  ;;  %v2811_v40 = vpack.i.b16 %v2810_v59, %v2809_v41 }
 0x14e   : > { %v5089_v3 = vpop.permute.xlu0 %854  ;;  %v1073_v39 = vpack.i.b16 %v1072_v58, %v1071_v34  ;;  %v3830_v58 = vcombine.high %v5044_v12, %v5044_v12 }
 0x14f   : > { %v5091_v61 = vpop.permute.xlu1 %884  ;;  %v5142_v59 = vrot.slane %v1067_v54, %v4544_v44  ;;  %v3835_v54 = vcombine.high %v5070_v51, %v5070_v51 }
 0x150   : > { %577 = vrot.lane.b32.xlu0 %v3622_v27, %s4109_s12  ;;  %v2803_v27 = vshrl.u32 %v4847_v14, 16  ;;  %v5145_v41 = vrot.slane %v1073_v39, %v4544_v44 }
 0x151   : > { %2678 = vrot.lane.b32.xlu1 %v3734_v57, %s4109_s12  ;;  %v3782_v57 = vcombine.high %v5026_v16, %v5026_v16  ;;  %v5127_v16 = vrot.slane %v1085_v38, %v4544_v44  ;;  %v3787_v38 = vcombine.high %v5052_v7, %v5052_v7  ;;  %v5160_v7 = vrot.slane %v1076_v32, %v4544_v44 }
 0x152   : > { %v5103_v21 = vpop.permute.xlu0 %849  ;;  %v2805_v0 = vpack.i.b16 %v2804_v8, %v2803_v27  ;;  %v1136_v39 = vcombine.low %v5142_v59, %v5145_v41 }
 0x153   : > { %v5109_v20 = vpop.permute.xlu1 %894 }
 0x154   : > { %2643 = vrot.lane.b32.xlu0 %v3727_v31, %s4109_s12  ;;  %v5124_v31 = vrot.slane %v1079_v45, %v4544_v44  ;;  %v5217_v32 = vrot.slane %v1136_v39, %v4552_v5 }
 0x155   : > { %617 = vrot.lane.b32.xlu1 %v3786_v60, %s4108_s11  ;;  %v1082_v60 = vpack.i.b16 %v4785_v33, %v4762_v37  ;;  %v5152_v37 = vrot.slane %v2805_v0, %v4544_v44  ;;  %v5155_v33 = vrot.slane %v2811_v40, %v4544_v44  ;;  %v5200_v0 = vrot.slane %v1064_v56, %v4544_v44 }
 0x156   : > { %v5121_v36 = vpop.permute.xlu0 %859  ;;  %v1204_v45 = vcombine.low %v5124_v31, %v5127_v16 }
 0x157   : > { %v5129_v34 = vpop.permute.xlu1 %1988  ;;  %v5168_v27 = vrot.slane %v1082_v60, %v4544_v44 }
 0x158   : > { %582 = vrot.lane.b32.xlu0 %v3782_v57, %s4108_s11  ;;  %v1070_v57 = vpack.i.b16 %v4811_v43, %v4775_v62  ;;  %v2808_v62 = vpack.i.b16 %v4974_v42, %v4956_v23  ;;  %v2930_v43 = vcombine.low %v5152_v37, %v5155_v33  ;;  %v5194_v50 = vrot.slane %v1204_v45, %v4552_v5 }
 0x159   : > { %2683 = vrot.lane.b32.xlu1 %v3834_v46, %s4108_s11  ;;  %v5178_v46 = vrot.slane %v2793_v25, %v4544_v44  ;;  %v1170_v14 = vcombine.low %v5160_v7, %v5168_v27  ;;  %v2790_v23 = vpack.i.b16 %v4937_v11, %v4868_v47  ;;  %v2796_v42 = vpack.i.b16 %v4986_v19, %v4965_v4 }
 0x15a   : > { %v5147_v8 = vpop.permute.xlu0 %1953  ;;  %v5205_v30 = vrot.slane %v1070_v57, %v4544_v44  ;;  %v5223_v60 = vrot.slane %v2808_v62, %v4544_v44  ;;  %v3658_v47 = vcombine.low %v5194_v50, %v5194_v50  ;;  %v5230_v11 = vrot.slane %v2930_v43, %v4552_v5 }
 0x15b   : > { %v5157_v12 = vpop.permute.xlu1 %1998  ;;  %v2862_v9 = vcombine.low %v5178_v46, %v5181_v26  ;;  %v5237_v19 = vrot.slane %v2790_v23, %v4544_v44  ;;  %v5240_v25 = vrot.slane %v2796_v42, %v4544_v44  ;;  %v3651_v45 = vcombine.low %v5217_v32, %v5217_v32 }
 0x15c   : > { %2648 = vrot.lane.b32.xlu0 %v3830_v58, %s4108_s11  ;;  %v5220_v58 = vrot.slane %v2802_v13, %v4544_v44  ;;  %v1102_v4 = vcombine.low %v5200_v0, %v5205_v30  ;;  %v5254_v39 = vrot.slane %v1170_v14, %v4552_v5 }
 0x15d   : > { %622 = vrot.lane.b32.xlu1 %v3787_v38, %s4110_s16  ;;  %v2828_v62 = vcombine.low %v5237_v19, %v5240_v25 }
 0x15e   : > { %v5183_v6 = vpop.permute.xlu0 %1963  ;;  %v2896_v56 = vcombine.low %v5220_v58, %v5223_v60  ;;  %v5265_v23 = vrot.slane %v1102_v4, %v4552_v5 }
 0x15f   : > { %v5191_v51 = vpop.permute.xlu1 %2008 }
 0x160   : > { %587 = vrot.lane.b32.xlu0 %v3783_v55, %s4110_s16  ;;  %v5247_v55 = vrot.slane %v2862_v9, %v4552_v5  ;;  %v3800_v9 = vcombine.high %v5254_v39, %v5254_v39  ;;  %v3796_v4 = vcombine.high %v5265_v23, %v5265_v23 }
 0x161   : > { %2688 = vrot.lane.b32.xlu1 %v3835_v54, %s4110_s16  ;;  %v3747_v54 = vcombine.low %v5230_v11, %v5230_v11 }
 0x162   : > { %v5214_v40 = vpop.permute.xlu0 %1973 }
 0x163   : > { %v5225_v38 = vpop.permute.xlu1 %2316 }
 0x164   : > { %2653 = vrot.lane.b32.xlu0 %v3831_v63, %s4110_s16  ;;  %v3740_v63 = vcombine.low %v5247_v55, %v5247_v55 }
 0x165   : > { %1260 = vrot.lane.b32.xlu1 %v3658_v47, %s4105_s28  ;;  %v5274_v47 = vrot.slane %v2896_v56, %v4552_v5 }
 0x166   : > { %v5242_v53 = vpop.permute.xlu0 %2281 }
 0x167   : > { %v1984_v57 = vpop.permute.xlu1 %1983 }
 0x168   : > { %1225 = vrot.lane.b32.xlu0 %v3651_v45, %s4105_s28  ;;  %v2032_v13 = vsel %vm624_vm6, %v4625_v35, %v1984_v57  ;;  %v5284_v57 = vrot.slane %v2828_v62, %v4552_v5 }
 0x169   : > { %2986 = vrot.lane.b32.xlu1 %v3747_v54, %s4105_s28  ;;  %v2034_v35 = vsel %vm628_vm7, %v2032_v13, %v5129_v34 }
 0x16a   : > { %v1949_v43 = vpop.permute.xlu0 %1948 }
 0x16b   : > { %v2017_v14 = vsel %vm624_vm6, %v4640_v17, %v1949_v43  ;;  %v1994_v42 = vpop.permute.xlu1 %1993  ;;  %v3840_v43 = vcombine.high %v5274_v47, %v5274_v47 }
 0x16c   : > { %2951 = vrot.lane.b32.xlu0 %v3740_v63, %s4105_s28  ;;  %v2036_v45 = vsel %vm631_vm8, %v2034_v35, %v1994_v42  ;;  %v2019_v17 = vsel %vm628_vm7, %v2017_v14, %v5147_v8  ;;  %v1171_v14 = vcombine.high %v5160_v7, %v5168_v27  ;;  %v1103_v7 = vcombine.high %v5200_v0, %v5205_v30  ;;  %v3699_v30 = vld [vmem:[%s5327_s21 + $0x10] sm:$0xf] }
 0x16d   : > { %1265 = vrot.lane.b32.xlu1 %v3800_v9, %s4104_s7  ;;  %v2038_v54 = vsel %vm634_vm9, %v2036_v45, %v5157_v12  ;;  %v3836_v12 = vcombine.high %v5284_v57, %v5284_v57  ;;  %v3801_v9 = vcombine.high %v5194_v50, %v5194_v50 }
 0x16e   : > { %v1959_v34 = vpop.permute.xlu0 %1958 }
 0x16f   : > { %v2021_v56 = vsel %vm631_vm8, %v2019_v17, %v1959_v34  ;;  %v2004_v13 = vpop.permute.xlu1 %2003  ;;  %v3797_v17 = vcombine.high %v5217_v32, %v5217_v32 }
 0x170   : > { %1230 = vrot.lane.b32.xlu0 %v3796_v4, %s4104_s7  ;;  %v2040_v8 = vsel %vm637_vm10, %v2038_v54, %v2004_v13  ;;  %v2023_v62 = vsel %vm634_vm9, %v2021_v56, %v5183_v6  ;;  %v3841_v56 = vcombine.high %v5230_v11, %v5230_v11  ;;  %v1185_v54 = vrot.slane %v1171_v14, %v4552_v5 }
 0x171   : > { %2991 = vrot.lane.b32.xlu1 %v3840_v43, %s4104_s7  ;;  %v2042_v45 = vsel %vm640_vm11, %v2040_v8, %v5191_v51  ;;  %v2897_v51 = vcombine.high %v5220_v58, %v5223_v60  ;;  %v3837_v58 = vcombine.high %v5247_v55, %v5247_v55  ;;  %v1117_v60 = vrot.slane %v1103_v7, %v4552_v5 }
 0x172   : > { %v1969_v63 = vpop.permute.xlu0 %1968  ;;  %v1205_v11 = vcombine.high %v5124_v31, %v5127_v16  ;;  %v3661_v43 = vcombine.low %v1185_v54, %v1185_v54  ;;  %v2931_v16 = vcombine.high %v5152_v37, %v5155_v33 }
 0x173   : > { %v2025_v35 = vsel %vm637_vm10, %v2023_v62, %v1969_v63  ;;  %v2014_v42 = vpop.permute.xlu1 %2013  ;;  %v2911_v8 = vrot.slane %v2897_v51, %v4552_v5  ;;  %v3654_v62 = vcombine.low %v1117_v60, %v1117_v60  ;;  %v3120_v51 = vshrl.u32 %v5018_v15, 16 }
 0x174   : > { %2956 = vrot.lane.b32.xlu0 %v3836_v12, %s4104_s7  ;;  %v2044_v6 = vsel %vm643_vm12, %v2042_v45, %v2014_v42  ;;  %v2027_v50 = vsel %vm640_vm11, %v2025_v35, %v5214_v40  ;;  %v2829_v40 = vcombine.high %v5237_v19, %v5240_v25  ;;  %v5939_v19 = vmov 0  }
 0x175   : > { %1270 = vrot.lane.b32.xlu1 %v3801_v9, %s4106_s9  ;;  %3700 = vmatprep.subr.msk.bf16.mxu0 %vm952_vm13, %v2044_v6  ;;  %v1137_v25 = vcombine.high %v5142_v59, %v5145_v41  ;;  %v3750_v12 = vcombine.low %v2911_v8, %v2911_v8  ;;  %v5358_v14 = vrot.slane %v1205_v11, %v4552_v5 }
 0x176   : > { %v1979_v27 = vpop.permute.xlu0 %1978  ;;  %v5351_v31 = vrot.slane %v2829_v40, %v4552_v5  ;;  %v2863_v59 = vcombine.high %v5178_v46, %v5181_v26  ;;  %v5376_v9 = vrot.slane %v2931_v16, %v4552_v5  ;;  %v3130_v11 = vpack.i.b16 %v5010_v1, %v4994_v29 }
 0x177   : > { %v2029_v34 = vsel %vm643_vm12, %v2027_v50, %v1979_v27  ;;  %v5319_v4 = vpop.permute.xlu1 %2311  ;;  %v5369_v37 = vrot.slane %v1137_v25, %v4552_v5  ;;  %v3662_v42 = vcombine.low %v5358_v14, %v5358_v14  ;;  %v3131_v27 = vshrl.u32 %v4994_v29, 16 }
 0x178   : > { %1235 = vrot.lane.b32.xlu0 %v3797_v17, %s4106_s9  ;;  %v2050_v0 = vsel %vm952_vm13, %v2029_v34, 0  ;;  %v3743_v35 = vcombine.low %v5351_v31, %v5351_v31  ;;  %v5385_v45 = vrot.slane %v2863_v59, %v4552_v5  ;;  %v3751_v7 = vcombine.low %v5376_v9, %v5376_v9 }
 0x179   : > { %2055 = vmatpush1.bf16.msra.mxu0 %v2050_v0  ;;  %2996 = vrot.lane.b32.xlu1 %v3841_v56, %s4106_s9  ;;  %v3655_v26 = vcombine.low %v5369_v37, %v5369_v37  ;;  %v3119_v17 = vshrl.u32 %v5003_v10, 16  ;;  %v3132_v50 = vshrl.u32 %v5010_v1, 16  ;;  %v3137_v34 = vshrl.u32 %v5028_v52, 16 }
 0x17a   : > { %v5332_v32 = vpop.permute.xlu0 %2276  ;;  %v3138_v56 = vshrl.u32 %v5056_v22, 16  ;;  %v5416_v29 = vrot.slane %v3130_v11, %v4544_v44 }
 0x17b   : > { %v5339_v13 = vpop.permute.xlu1 %2321  ;;  %v3121_v25 = vpack.i.b16 %v3120_v51, %v3119_v17  ;;  %v3838_v17 = vcombine.high %v5351_v31, %v5351_v31  ;;  %v5941_v51 = vld [vmem:[#allocation15_spill] sm:$0xff] }
 0x17c   : > { %2961 = vrot.lane.b32.xlu0 %v3837_v58, %s4106_s9  ;;  %3701 = vmatmul.mubr.msk.bf16.vlgmr.msra.gmra.mrb[0].mxu0 %vm948_vm14, %v3699_v30  ;;  %v3744_v30 = vcombine.low %v5385_v45, %v5385_v45  ;;  %v3802_v58 = vcombine.high %v1185_v54, %v1185_v54  ;;  %v3139_v16 = vpack.i.b16 %v3138_v56, %v3137_v34 }
 0x17d   : > { %1275 = vrot.lane.b32.xlu1 %v3661_v43, %s4107_s8  ;;  %2414 = vmatprep.mubr.bf16.mxu0 %v5939_v19  ;;  %v3133_v43 = vpack.i.b16 %v3132_v50, %v3131_v27  ;;  %v3136_v54 = vpack.i.b16 %v5056_v22, %v5028_v52  ;;  %v5425_v52 = vrot.slane %v3121_v25, %v4544_v44  ;;  %v5944_v25 = vld [vmem:[#allocation17_spill] sm:$0xff] }
 0x17e   : > { %v5348_v55 = vpop.permute.xlu0 %2286  ;;  %v5428_v22 = vrot.slane %v3139_v16, %v4544_v44  ;;  %v3803_v56 = vcombine.high %v5358_v14, %v5358_v14 }
 0x17f   : > { %v5355_v63 = vpop.permute.xlu1 %899  ;;  %v5419_v27 = vrot.slane %v3133_v43, %v4544_v44  ;;  %v5433_v50 = vrot.slane %v3136_v54, %v4544_v44 }
 0x180   : > { %1240 = vrot.lane.b32.xlu0 %v3654_v62, %s4107_s8  ;;  %v3125_v62 = vshrl.u32 %v5038_v48, 16 }
 0x181   : > { %3001 = vrot.lane.b32.xlu1 %v3750_v12, %s4107_s8  ;;  %v3126_v12 = vshrl.u32 %v5072_v28, 16  ;;  %v3258_v14 = vcombine.low %v5419_v27, %v5428_v22 }
 0x182   : > { %v5364_v41 = vpop.permute.xlu0 %864 }
 0x183   : > { %v5371_v33 = vpop.permute.xlu1 %2326 }
 0x184   : > { %2966 = vrot.lane.b32.xlu0 %v3743_v35, %s4107_s8  ;;  %v3798_v35 = vcombine.high %v1117_v60, %v1117_v60  ;;  %v3118_v60 = vpack.i.b16 %v5018_v15, %v5003_v10  ;;  %v918_v15 = vsel %vm624_vm6, %v5941_v51, %v5103_v21  ;;  %v3799_v21 = vcombine.high %v5369_v37, %v5369_v37 }
 0x185   : > { %1280 = vrot.lane.b32.xlu1 %v3662_v42, %s4109_s12 }
 0x186   : > { %v5380_v46 = vpop.permute.xlu0 %2291 }
 0x187   : > { %v905_v6 = vpop.permute.xlu1 %904 }
 0x188   : > { %1245 = vrot.lane.b32.xlu0 %v3655_v26, %s4109_s12  ;;  %v3842_v26 = vcombine.high %v2911_v8, %v2911_v8 }
 0x189   : > { %3006 = vrot.lane.b32.xlu1 %v3751_v7, %s4109_s12  ;;  %v5940_v7 = vld [vmem:[#allocation14_spill] sm:$0xff] }
 0x18a   : > { %v870_v0 = vpop.permute.xlu0 %869  ;;  %v933_v1 = vsel %vm624_vm6, %v5940_v7, %v5091_v61  ;;  %v3127_v61 = vpack.i.b16 %v3126_v12, %v3125_v62  ;;  %v2345_v62 = vsel %vm624_vm6, %v5944_v25, %v5332_v32 }
 0x18b   : > { %v5399_v40 = vpop.permute.xlu1 %2331  ;;  %v935_v10 = vsel %vm628_vm7, %v933_v1, %v5074_v2  ;;  %v2347_v7 = vsel %vm628_vm7, %v2345_v62, %v5242_v53  ;;  %v3716_v62 = vld [vmem:[%s5327_s21 + $0x14] sm:$0xf] }
 0x18c   : > { %2971 = vrot.lane.b32.xlu0 %v3744_v30, %s4109_s12  ;;  %v3124_v30 = vpack.i.b16 %v5072_v28, %v5038_v48  ;;  %v937_v31 = vsel %vm631_vm8, %v935_v10, %v5109_v20  ;;  %v3843_v48 = vcombine.high %v5376_v9, %v5376_v9  ;;  %v3839_v20 = vcombine.high %v5385_v45, %v5385_v45 }
 0x18d   : > { %1285 = vrot.lane.b32.xlu1 %v3802_v58, %s4108_s11  ;;  %v5942_v58 = vld [vmem:[#allocation16_spill] sm:$0xff]  ;;  %v939_v2 = vsel %vm634_vm9, %v937_v31, %v5355_v63  ;;  %v5943_v28 = vcombine.low %v4829_v24, %v4833_v49  ;;  %v5468_v37 = vrot.slane %v3127_v61, %v4544_v44  ;;  %v920_v63 = vsel %vm628_vm7, %v918_v15, %v5089_v3 }
 0x18e   : > { %v5407_v59 = vpop.permute.xlu0 %2296  ;;  %v2360_v11 = vsel %vm624_vm6, %v5942_v58, %v5319_v4  ;;  %v941_v9 = vsel %vm637_vm10, %v939_v2, %v905_v6  ;;  %v922_v45 = vsel %vm631_vm8, %v920_v63, %v5121_v36  ;;  %v5945_v6 = vld [vmem:[#allocation18_spill] sm:$0xff]  ;;  %v2349_v61 = vsel %vm631_vm8, %v2347_v7, %v5348_v55  ;;  %v5948_v31 = vld [vmem:[#allocation8_spill] sm:$0xff] }
 0x18f   : > { %v910_v42 = vpop.permute.xlu1 %909  ;;  %v5463_v4 = vrot.slane %v5943_v28, %v4552_v5  ;;  %v2362_v16 = vsel %vm628_vm7, %v2360_v11, %v5225_v38  ;;  %v924_v3 = vsel %vm634_vm9, %v922_v45, %v5364_v41  ;;  %v5946_v32 = vcombine.low %v4797_v18, %v5945_v6  ;;  %v3646_v11 = vld [vmem:[%s5327_s21 + $0x4] sm:$0xf] }
 0x190   : > { %1250 = vrot.lane.b32.xlu0 %v3798_v35, %s4108_s11  ;;  %v943_v12 = vsel %vm640_vm11, %v941_v9, %v910_v42  ;;  %v2364_v54 = vsel %vm631_vm8, %v2362_v16, %v5339_v13  ;;  %v926_v42 = vsel %vm637_vm10, %v924_v3, %v870_v0  ;;  %v3190_v41 = vcombine.low %v5425_v52, %v5468_v37 }
 0x191   : > { %3011 = vrot.lane.b32.xlu1 %v3842_v26, %s4108_s11  ;;  %v5491_v26 = vrot.slane %v5946_v32, %v4552_v5  ;;  %v2366_v38 = vsel %vm634_vm9, %v2364_v54, %v5371_v33  ;;  %v3675_v13 = vcombine.low %v5463_v4, %v5463_v4  ;;  %v3266_v10 = vrot.slane %v3258_v14, %v4552_v5 }
 0x192   : > { %v875_v8 = vpop.permute.xlu0 %874  ;;  %v2368_v1 = vsel %vm637_vm10, %v2366_v38, %v5399_v40  ;;  %v2351_v53 = vsel %vm634_vm9, %v2349_v61, %v5380_v46  ;;  %v3155_v2 = vrot.slane %v3124_v30, %v4544_v44  ;;  %v3224_v28 = vcombine.low %v5416_v29, %v5433_v50  ;;  %v5951_v30 = vld [vmem:[#allocation9_spill] sm:$0xff] }
 0x193   : > { %v2337_v34 = vpop.permute.xlu1 %2336  ;;  %v928_v33 = vsel %vm640_vm11, %v926_v42, %v875_v8  ;;  %v2353_v55 = vsel %vm637_vm10, %v2351_v53, %v5407_v59  ;;  %v3198_v59 = vrot.slane %v3190_v41, %v4552_v5  ;;  %v3764_v9 = vcombine.low %v3266_v10, %v3266_v10 }
 0x194   : > { %2976 = vrot.lane.b32.xlu0 %v3838_v17, %s4108_s11  ;;  %v2370_v17 = vsel %vm640_vm11, %v2368_v1, %v2337_v34  ;;  %v5947_v34 = vld [vmem:[#allocation7_spill] sm:$0xff]  ;;  %v5558_v3 = vrot.slane %v3224_v28, %v4552_v5  ;;  %v3809_v41 = vcombine.high %v5463_v4, %v5463_v4  ;;  %v3849_v53 = vcombine.high %v3266_v10, %v3266_v10 }
 0x195   : > { %1290 = vrot.lane.b32.xlu1 %v3803_v56, %s4110_s16  ;;  %v3668_v56 = vcombine.low %v5491_v26, %v5491_v26  ;;  %v5949_v58 = vcombine.low %v5947_v34, %v5948_v31  ;;  %v5953_v61 = vcombine.high %v5947_v34, %v5948_v31  ;;  %v3845_v34 = vcombine.high %v3198_v59, %v3198_v59 }
 0x196   : > { %v2302_v43 = vpop.permute.xlu0 %2301 }
 0x197   : > { %v915_v35 = vpop.permute.xlu1 %914  ;;  %v5526_v46 = vrot.slane %v5949_v58, %v4552_v5 }
 0x198   : > { %1255 = vrot.lane.b32.xlu0 %v3799_v21, %s4110_s16  ;;  %v945_v36 = vsel %vm643_vm12, %v943_v12, %v915_v35  ;;  %v3147_v21 = vrot.slane %v3118_v60, %v4544_v44  ;;  %v5950_v44 = vld [vmem:[#allocation6_spill] sm:$0xff]  ;;  %v3757_v35 = vcombine.low %v3198_v59, %v3198_v59  ;;  %v5956_v59 = vcombine.high %v4797_v18, %v5945_v6 }
 0x199   : > { %3016 = vrot.lane.b32.xlu1 %v3843_v48, %s4110_s16  ;;  %3647 = vmatprep.subr.msk.bf16.mxu1 %vm952_vm13, %v945_v36  ;;  %v2355_v48 = vsel %vm640_vm11, %v2353_v55, %v2302_v43  ;;  %v5952_v43 = vcombine.low %v5950_v44, %v5951_v30  ;;  %v3808_v25 = vcombine.high %v5526_v46, %v5526_v46 }
 0x19a   : > { %v880_v0 = vpop.permute.xlu0 %879  ;;  %v3156_v16 = vcombine.low %v3147_v21, %v3155_v2  ;;  %v1546_v28 = vrot.slane %v5956_v59, %v4552_v5 }
 0x19b   : > { %v930_v51 = vsel %vm643_vm12, %v928_v33, %v880_v0  ;;  %v2342_v15 = vpop.permute.xlu1 %2341  ;;  %v5545_v45 = vrot.slane %v5952_v43, %v4552_v5  ;;  %v3805_v0 = vcombine.high %v5491_v26, %v5491_v26  ;;  %v5954_v26 = vcombine.high %v5950_v44, %v5951_v30 }
 0x19c   : > { %2981 = vrot.lane.b32.xlu0 %v3839_v20, %s4110_s16  ;;  %v953_v40 = vsel %vm952_vm13, %v930_v51, 0  ;;  %v2372_v8 = vsel %vm643_vm12, %v2370_v17, %v2342_v15  ;;  %v5569_v38 = vrot.slane %v3156_v16, %v4552_v5  ;;  %v1580_v17 = vrot.slane %v5953_v61, %v4552_v5 }
 0x19d   : > { %958 = vmatpush1.bf16.msra.mxu1 %v953_v40  ;;  %1655 = vrot.lane.b32.xlu1 %v3675_v13, %s4105_s28  ;;  %v3804_v36 = vcombine.high %v5545_v45, %v5545_v45  ;;  %v3848_v13 = vcombine.high %v5558_v3, %v5558_v3  ;;  %v3225_v51 = vcombine.high %v5416_v29, %v5433_v50 }
 0x19e   : > { %v2307_v20 = vpop.permute.xlu0 %2306  ;;  %3717 = vmatprep.subr.msk.bf16.mxu0 %vm952_vm13, %v2372_v8  ;;  %v3844_v1 = vcombine.high %v5569_v38, %v5569_v38  ;;  %v1512_v40 = vrot.slane %v5954_v26, %v4552_v5  ;;  %v3678_v8 = vcombine.low %v1580_v17, %v1580_v17  ;;  %v5955_v50 = vcombine.high %v4829_v24, %v4833_v49  ;;  %v5958_v26 = vld [vmem:[#allocation10_spill] sm:$0xff] }
 0x19f   : > { %v2357_v14 = vsel %vm643_vm12, %v2355_v48, %v2307_v20  ;;  %v5537_v63 = vpop.permute.xlu1 %592  ;;  %v3239_v58 = vrot.slane %v3225_v51, %v4552_v5  ;;  %v3191_v49 = vcombine.high %v5425_v52, %v5468_v37  ;;  %v3810_v52 = vcombine.high %v1580_v17, %v1580_v17 }
 0x1a0   : > { %v2378_v60 = vsel %vm952_vm13, %v2357_v14, 0  ;;  %1620 = vrot.lane.b32.xlu0 %v3668_v56, %s4105_s28  ;;  %3648 = vmatmul.mubr.msk.bf16.vlgmr.msra.gmra.mrb[0].mxu1 %vm948_vm14, %v3646_v11  ;;  %v3157_v56 = vcombine.high %v3147_v21, %v3155_v2  ;;  %v3671_v29 = vcombine.low %v1512_v40, %v1512_v40  ;;  %v1614_v10 = vrot.slane %v5955_v50, %v4552_v5 }
 0x1a1   : > { %2383 = vmatpush1.bf16.msra.mxu0 %v2378_v60  ;;  %3314 = vrot.lane.b32.xlu1 %v3764_v9, %s4105_s28  ;;  %v3259_v2 = vcombine.high %v5419_v27, %v5428_v22  ;;  %v3767_v20 = vcombine.low %v3239_v58, %v3239_v58  ;;  %v3672_v22 = vcombine.low %v1546_v28, %v1546_v28 }
 0x1a2   : > { %v5552_v12 = vpop.permute.xlu0 %557  ;;  %1037 = vmatprep.mubr.bf16.mxu1 %v5939_v19  ;;  %v3171_v21 = vrot.slane %v3157_v56, %v4552_v5  ;;  %v3679_v24 = vcombine.low %v1614_v10, %v1614_v10  ;;  %v3205_v18 = vrot.slane %v3191_v49, %v4552_v5 }
 0x1a3   : > { %v5555_v54 = vpop.permute.xlu1 %2658  ;;  %v3273_v27 = vrot.slane %v3259_v2, %v4552_v5  ;;  %v3811_v5 = vcombine.high %v1614_v10, %v1614_v10  ;;  %v5960_v2 = vld [vmem:[#allocation11_spill] sm:$0xff] }
 0x1a4   : > { %3279 = vrot.lane.b32.xlu0 %v3757_v35, %s4105_s28  ;;  %3718 = vmatmul.mubr.msk.bf16.vlgmr.msra.gmra.mrb[0].mxu0 %vm948_vm14, %v3716_v62  ;;  %v3760_v9 = vcombine.low %v3171_v21, %v3171_v21  ;;  %v3761_v43 = vcombine.low %v3205_v18, %v3205_v18  ;;  %v3806_v62 = vcombine.high %v1512_v40, %v1512_v40 }
 0x1a5   : > { %1660 = vrot.lane.b32.xlu1 %v3808_v25, %s4104_s7  ;;  %2761 = vmatprep.mubr.bf16.mxu0 %v5939_v19  ;;  %v3768_v30 = vcombine.low %v3273_v27, %v3273_v27  ;;  %v627_v40 = vsel %vm624_vm6, %v5958_v26, %v5552_v12  ;;  %v3851_v10 = vcombine.high %v3273_v27, %v3273_v27 }
 0x1a6   : > { %v5566_v32 = vpop.permute.xlu0 %2623 }
 0x1a7   : > { %v5571_v42 = vpop.permute.xlu1 %597 }
 0x1a8   : > { %1625 = vrot.lane.b32.xlu0 %v3804_v36, %s4104_s7  ;;  %v3850_v36 = vcombine.high %v3239_v58, %v3239_v58 }
 0x1a9   : > { %3319 = vrot.lane.b32.xlu1 %v3848_v13, %s4104_s7  ;;  %v5957_v13 = vld [vmem:[#allocation12_spill] sm:$0xff] }
 0x1aa   : > { %v5579_v7 = vpop.permute.xlu0 %562 }
 0x1ab   : > { %v5583_v33 = vpop.permute.xlu1 %2663 }
 0x1ac   : > { %3284 = vrot.lane.b32.xlu0 %v3844_v1, %s4104_s7  ;;  %s3616_s7 = sshll.u32 %s374_s6, 3  ;;  %s3776_s6 = sshll.u32 %s4086_s23, 2 }
 0x1ad   : > { %1665 = vrot.lane.b32.xlu1 %v3809_v41, %s4106_s9  ;;  %v648_v41 = vsel %vm624_vm6, %v5957_v13, %v5537_v63  ;;  %v5959_v63 = vld [vmem:[#allocation13_spill] sm:$0xff] }
 0x1ae   : > { %v5593_v4 = vpop.permute.xlu0 %2628  ;;  %v650_v61 = vsel %vm628_vm7, %v648_v41, %v5571_v42  ;;  %v2707_v56 = vsel %vm624_vm6, %v5959_v63, %v5555_v54  ;;  %v630_v42 = vsel %vm628_vm7, %v627_v40, %v5579_v7 }
 0x1af   : > { %v603_v15 = vpop.permute.xlu1 %602  ;;  %v2709_v58 = vsel %vm628_vm7, %v2707_v56, %v5583_v33 }
 0x1b0   : > { %1630 = vrot.lane.b32.xlu0 %v3805_v0, %s4106_s9  ;;  %v3846_v0 = vcombine.high %v3171_v21, %v3171_v21  ;;  %v652_v51 = vsel %vm631_vm8, %v650_v61, %v603_v15 }
 0x1b1   : > { %3324 = vrot.lane.b32.xlu1 %v3849_v53, %s4106_s9  ;;  %v3807_v53 = vcombine.high %v1546_v28, %v1546_v28 }
 0x1b2   : > { %v568_v55 = vpop.permute.xlu0 %567 }
 0x1b3   : > { %v5603_v31 = vpop.permute.xlu1 %2668 }
 0x1b4   : > { %3289 = vrot.lane.b32.xlu0 %v3845_v34, %s4106_s9  ;;  %v2711_v21 = vsel %vm631_vm8, %v2709_v58, %v5603_v31 }
 0x1b5   : > { %1670 = vrot.lane.b32.xlu1 %v3678_v8, %s4107_s8 }
 0x1b6   : > { %v5612_v11 = vpop.permute.xlu0 %2633 }
 0x1b7   : > { %v608_v48 = vpop.permute.xlu1 %607 }
 0x1b8   : > { %1635 = vrot.lane.b32.xlu0 %v3671_v29, %s4107_s8  ;;  %v654_v8 = vsel %vm634_vm9, %v652_v51, %v608_v48  ;;  %v633_v29 = vsel %vm631_vm8, %v630_v42, %v568_v55  ;;  %v2692_v48 = vsel %vm624_vm6, %v5960_v2, %v5566_v32 }
 0x1b9   : > { %3329 = vrot.lane.b32.xlu1 %v3767_v20, %s4107_s8  ;;  %v2694_v31 = vsel %vm628_vm7, %v2692_v48, %v5593_v4 }
 0x1ba   : > { %v573_v14 = vpop.permute.xlu0 %572  ;;  %v2696_v32 = vsel %vm631_vm8, %v2694_v31, %v5612_v11  ;;  %v661_v11 = vld [vmem:[%s5327_s21] sm:$0xf] }
 0x1bb   : > { %v2674_v60 = vpop.permute.xlu1 %2673  ;;  %v636_v54 = vsel %vm634_vm9, %v633_v29, %v573_v14 }
 0x1bc   : > { %3294 = vrot.lane.b32.xlu0 %v3760_v9, %s4107_s8  ;;  %v2713_v33 = vsel %vm634_vm9, %v2711_v21, %v2674_v60  ;;  %s380_s8 = scalar_lea.vmem %s5851_s4, %s3616_s7 }
 0x1bd   : > { %1675 = vrot.lane.b32.xlu1 %v3679_v24, %s4109_s12  ;;  %v3847_v24 = vcombine.high %v3205_v18, %v3205_v18 }
 0x1be   : > { %v2639_v44 = vpop.permute.xlu0 %2638 }
 0x1bf   : > { %v613_v6 = vpop.permute.xlu1 %612  ;;  %v2698_v60 = vsel %vm634_vm9, %v2696_v32, %v2639_v44 }
 0x1c0   : > { %1640 = vrot.lane.b32.xlu0 %v3672_v22, %s4109_s12  ;;  %v656_v15 = vsel %vm637_vm10, %v654_v8, %v613_v6 }
 0x1c1   : > { %3334 = vrot.lane.b32.xlu1 %v3768_v30, %s4109_s12 }
 0x1c2   : > { %v578_v37 = vpop.permute.xlu0 %577 }
 0x1c3   : > { %v2679_v25 = vpop.permute.xlu1 %2678  ;;  %v639_v55 = vsel %vm637_vm10, %v636_v54, %v578_v37  ;;  %v3737_v37 = vld [vmem:[%s5327_s21 + $0x18] sm:$0xf] }
 0x1c4   : > { %3299 = vrot.lane.b32.xlu0 %v3761_v43, %s4109_s12  ;;  %v2715_v20 = vsel %vm637_vm10, %v2713_v33, %v2679_v25 }
 0x1c5   : > { %1680 = vrot.lane.b32.xlu1 %v3810_v52, %s4108_s11 }
 0x1c6   : > { %v2644_v16 = vpop.permute.xlu0 %2643 }
 0x1c7   : > { %v618_v35 = vpop.permute.xlu1 %617  ;;  %v2700_v22 = vsel %vm637_vm10, %v2698_v60, %v2644_v16 }
 0x1c8   : > { %1645 = vrot.lane.b32.xlu0 %v3806_v62, %s4108_s11  ;;  %v658_v12 = vsel %vm640_vm11, %v656_v15, %v618_v35 }
 0x1c9   : > { %3339 = vrot.lane.b32.xlu1 %v3850_v36, %s4108_s11 }
 0x1ca   : > { %v583_v1 = vpop.permute.xlu0 %582 }
 0x1cb   : > { %v2684_v17 = vpop.permute.xlu1 %2683  ;;  %v642_v59 = vsel %vm640_vm11, %v639_v55, %v583_v1 }
 0x1cc   : > { %3304 = vrot.lane.b32.xlu0 %v3846_v0, %s4108_s11  ;;  %v2717_v49 = vsel %vm640_vm11, %v2715_v20, %v2684_v17 }
 0x1cd   : > { %1685 = vrot.lane.b32.xlu1 %v3811_v5, %s4110_s16 }
 0x1ce   : > { %v2649_v34 = vpop.permute.xlu0 %2648 }
 0x1cf   : > { %v623_v50 = vpop.permute.xlu1 %622  ;;  %v2702_v18 = vsel %vm640_vm11, %v2700_v22, %v2649_v34 }
 0x1d0   : > { %1650 = vrot.lane.b32.xlu0 %v3807_v53, %s4110_s16  ;;  %v660_v7 = vsel %vm643_vm12, %v658_v12, %v623_v50 }
 0x1d1   : > { %3344 = vrot.lane.b32.xlu1 %v3851_v10, %s4110_s16  ;;  %3649 = vmatprep.subr.msk.bf16.mxu1 %vm952_vm13, %v660_v7 }
 0x1d2   : > { %v588_v28 = vpop.permute.xlu0 %587 }
 0x1d3   : > { %v645_v14 = vsel %vm643_vm12, %v642_v59, %v588_v28  ;;  %v2689_v9 = vpop.permute.xlu1 %2688 }
 0x1d4   : > { %v1001_v4 = vsel %vm952_vm13, %v645_v14, 0  ;;  %3309 = vrot.lane.b32.xlu0 %v3847_v24, %s4110_s16  ;;  %v2719_v27 = vsel %vm643_vm12, %v2717_v49, %v2689_v9  ;;  %s376_s16 = scalar_lea.vmem %s5850_s3, %s3616_s7 }
 0x1d5   : > { %1006 = vmatpush1.bf16.msra.mxu1 %v1001_v4  ;;  %3738 = vmatprep.subr.msk.bf16.mxu0 %vm952_vm13, %v2719_v27 }
 0x1d6   : > { %v2654_v6 = vpop.permute.xlu0 %2653 }
 0x1d7   : > { %v2704_v30 = vsel %vm643_vm12, %v2702_v18, %v2654_v6  ;;  %v1261_v52 = vpop.permute.xlu1 %1260  ;;  %v3665_v18 = vld [vmem:[%s5327_s21 + $0x8] sm:$0xf] }
 0x1d8   : > { %v2725_v44 = vsel %vm952_vm13, %v2704_v30, 0  ;;  %3650 = vmatmul.mubr.msk.bf16.vlgmr.msra.gmra.mrb[0].mxu1 %vm948_vm14, %v661_v11  ;;  %v1309_v42 = vsel %vm624_vm6, %v5254_v39, %v1261_v52 }
 0x1d9   : > { %2730 = vmatpush1.bf16.msra.mxu0 %v2725_v44  ;;  %1363 = vmatprep.mubr.bf16.mxu1 %v5939_v19 }
 0x1da   : > { %v1226_v43 = vpop.permute.xlu0 %1225 }
 0x1db   : > { %v2987_v25 = vpop.permute.xlu1 %2986  ;;  %v1294_v12 = vsel %vm624_vm6, %v5265_v23, %v1226_v43  ;;  %v3754_v43 = vld [vmem:[%s5327_s21 + $0x1c] sm:$0xf] }
 0x1dc   : > { %3739 = vmatmul.mubr.msk.bf16.vlgmr.msra.gmra.mrb[0].mxu0 %vm948_vm14, %v3737_v37  ;;  %v3035_v10 = vsel %vm624_vm6, %v5274_v47, %v2987_v25 }
 0x1dd   : > { %3089 = vmatprep.mubr.bf16.mxu0 %v5939_v19 }
 0x1de   : > { %v2952_v62 = vpop.permute.xlu0 %2951 }
 0x1df   : > { %v1266_v16 = vpop.permute.xlu1 %1265  ;;  %v3020_v47 = vsel %vm624_vm6, %v5284_v57, %v2952_v62 }
 0x1e0   : > { %v1311_v34 = vsel %vm628_vm7, %v1309_v42, %v1266_v16 }
 0x1e2   : > { %v1231_v35 = vpop.permute.xlu0 %1230 }
 0x1e3   : > { %v2992_v36 = vpop.permute.xlu1 %2991  ;;  %v1296_v21 = vsel %vm628_vm7, %v1294_v12, %v1231_v35 }
 0x1e4   : > { %v3037_v39 = vsel %vm628_vm7, %v3035_v10, %v2992_v36 }
 0x1e6   : > { %v2957_v5 = vpop.permute.xlu0 %2956 }
 0x1e7   : > { %v1271_v13 = vpop.permute.xlu1 %1270  ;;  %v3022_v28 = vsel %vm628_vm7, %v3020_v47, %v2957_v5 }
 0x1e8   : > { %v1313_v29 = vsel %vm631_vm8, %v1311_v34, %v1271_v13 }
 0x1ea   : > { %v1236_v41 = vpop.permute.xlu0 %1235 }
 0x1eb   : > { %v2997_v1 = vpop.permute.xlu1 %2996  ;;  %v1298_v2 = vsel %vm631_vm8, %v1296_v21, %v1236_v41 }
 0x1ec   : > { %v3039_v55 = vsel %vm631_vm8, %v3037_v39, %v2997_v1 }
 0x1ee   : > { %v2962_v0 = vpop.permute.xlu0 %2961 }
 0x1ef   : > { %v1276_v61 = vpop.permute.xlu1 %1275  ;;  %v3024_v14 = vsel %vm631_vm8, %v3022_v28, %v2962_v0 }
 0x1f0   : > { %v1315_v50 = vsel %vm634_vm9, %v1313_v29, %v1276_v61 }
 0x1f2   : > { %v1241_v17 = vpop.permute.xlu0 %1240 }
 0x1f3   : > { %v3002_v51 = vpop.permute.xlu1 %3001  ;;  %v1300_v23 = vsel %vm634_vm9, %v1298_v2, %v1241_v17 }
 0x1f4   : > { %v3041_v20 = vsel %vm634_vm9, %v3039_v55, %v3002_v51 }
 0x1f6   : > { %v2967_v53 = vpop.permute.xlu0 %2966 }
 0x1f7   : > { %v1281_v26 = vpop.permute.xlu1 %1280  ;;  %v3026_v4 = vsel %vm634_vm9, %v3024_v14, %v2967_v53 }
 0x1f8   : > { %v1317_v54 = vsel %vm637_vm10, %v1315_v50, %v1281_v26 }
 0x1fa   : > { %v1246_v40 = vpop.permute.xlu0 %1245 }
 0x1fb   : > { %v3007_v8 = vpop.permute.xlu1 %3006  ;;  %v1302_v59 = vsel %vm637_vm10, %v1300_v23, %v1246_v40 }
 0x1fc   : > { %v3043_v24 = vsel %vm637_vm10, %v3041_v20, %v3007_v8 }
 0x1fe   : > { %v2972_v63 = vpop.permute.xlu0 %2971 }
 0x1ff   : > { %v1286_v56 = vpop.permute.xlu1 %1285  ;;  %v3028_v11 = vsel %vm637_vm10, %v3026_v4, %v2972_v63  ;;  %v3682_v4 = vld [vmem:[%s5327_s21 + $0xc] sm:$0xf] }
 0x200   : > { %v1319_v48 = vsel %vm640_vm11, %v1317_v54, %v1286_v56 }
 0x202   : > { %v1251_v15 = vpop.permute.xlu0 %1250 }
 0x203   : > { %v3012_v58 = vpop.permute.xlu1 %3011  ;;  %v1304_v32 = vsel %vm640_vm11, %v1302_v59, %v1251_v15 }
 0x204   : > { %v3045_v9 = vsel %vm640_vm11, %v3043_v24, %v3012_v58 }
 0x206   : > { %v2977_v7 = vpop.permute.xlu0 %2976 }
 0x207   : > { %v1291_v33 = vpop.permute.xlu1 %1290  ;;  %v3030_v6 = vsel %vm640_vm11, %v3028_v11, %v2977_v7 }
 0x208   : > { %v1321_v31 = vsel %vm643_vm12, %v1319_v48, %v1291_v33 }
 0x209   : > { %3666 = vmatprep.subr.msk.bf16.mxu1 %vm952_vm13, %v1321_v31 }
 0x20a   : > { %v1256_v49 = vpop.permute.xlu0 %1255 }
 0x20b   : > { %v1306_v57 = vsel %vm643_vm12, %v1304_v32, %v1256_v49  ;;  %v3017_v60 = vpop.permute.xlu1 %3016 }
 0x20c   : > { %v1327_v27 = vsel %vm952_vm13, %v1306_v57, 0  ;;  %v3047_v22 = vsel %vm643_vm12, %v3045_v9, %v3017_v60 }
 0x20d   : > { %1332 = vmatpush1.bf16.msra.mxu1 %v1327_v27  ;;  %3755 = vmatprep.subr.msk.bf16.mxu0 %vm952_vm13, %v3047_v22 }
 0x20e   : > { %v2982_v30 = vpop.permute.xlu0 %2981 }
 0x20f   : > { %v3032_v52 = vsel %vm643_vm12, %v3030_v6, %v2982_v30  ;;  %v1656_v44 = vpop.permute.xlu1 %1655  ;;  %v3771_v6 = vld [vmem:[%s5327_s21 + $0x20] sm:$0xf]  ;;  %s3775_s21 = sshll.u32 %s4082_s22, 1  ;;  %s3465_s22 = scalar_lea.sflag [#allocation4], %s361_s17 }
 0x210   : > { %v3053_v37 = vsel %vm952_vm13, %v3032_v52, 0  ;;  %3667 = vmatmul.mubr.msk.bf16.vlgmr.msra.gmra.mrb[0].mxu1 %vm948_vm14, %v3665_v18  ;;  %s3477_s28 = sadd.s32 %s3776_s6, %s3775_s21 }
 0x211   : > { %3058 = vmatpush1.bf16.msra.mxu0 %v3053_v37  ;;  %1758 = vmatprep.mubr.bf16.mxu1 %v5939_v19  ;;  %s3777_s9 = sshll.u32 %s3477_s28, 7 }
 0x212   : > { %v1621_v25 = vpop.permute.xlu0 %1620  ;;  %s5788_s12 = scalar_lea.hbm %s5852_s5, %s3777_s9 }
 0x213   : > { %v3315_v62 = vpop.permute.xlu1 %3314  ;;  %v1689_v12 = vsel %vm624_vm6, %v5545_v45, %v1621_v25 }
 0x214   : > { %3756 = vmatmul.mubr.msk.bf16.vlgmr.msra.gmra.mrb[0].mxu0 %vm948_vm14, %v3754_v43  ;;  %v3363_v10 = vsel %vm624_vm6, %v5558_v3, %v3315_v62 }
 0x215   : > { %3417 = vmatprep.mubr.bf16.mxu0 %v5939_v19  ;;  %v1704_v19 = vsel %vm624_vm6, %v5526_v46, %v1656_v44 }
 0x216   : > { %v3280_v16 = vpop.permute.xlu0 %3279 }
 0x217   : > { %v1661_v35 = vpop.permute.xlu1 %1660  ;;  %v3348_v3 = vsel %vm624_vm6, %v5569_v38, %v3280_v16 }
 0x218   : > { %v1706_v34 = vsel %vm628_vm7, %v1704_v19, %v1661_v35 }
 0x21a   : > { %v1626_v36 = vpop.permute.xlu0 %1625 }
 0x21b   : > { %v3320_v5 = vpop.permute.xlu1 %3319  ;;  %v1691_v21 = vsel %vm628_vm7, %v1689_v12, %v1626_v36 }
 0x21c   : > { %v3365_v46 = vsel %vm628_vm7, %v3363_v10, %v3320_v5 }
 0x21e   : > { %v3285_v13 = vpop.permute.xlu0 %3284 }
 0x21f   : > { %v1666_v41 = vpop.permute.xlu1 %1665  ;;  %v3350_v47 = vsel %vm628_vm7, %v3348_v3, %v3285_v13 }
 0x220   : > { %v1708_v29 = vsel %vm631_vm8, %v1706_v34, %v1666_v41 }
 0x222   : > { %v1631_v1 = vpop.permute.xlu0 %1630 }
 0x223   : > { %v3325_v0 = vpop.permute.xlu1 %3324  ;;  %v1693_v39 = vsel %vm631_vm8, %v1691_v21, %v1631_v1 }
 0x224   : > { %v3367_v33 = vsel %vm631_vm8, %v3365_v46, %v3325_v0 }
 0x226   : > { %v3290_v61 = vpop.permute.xlu0 %3289 }
 0x227   : > { %v1671_v17 = vpop.permute.xlu1 %1670  ;;  %v3352_v24 = vsel %vm631_vm8, %v3350_v47, %v3290_v61 }
 0x228   : > { %v1710_v50 = vsel %vm634_vm9, %v1708_v29, %v1671_v17 }
 0x22a   : > { %v1636_v51 = vpop.permute.xlu0 %1635 }
 0x22b   : > { %v3330_v53 = vpop.permute.xlu1 %3329  ;;  %v1695_v45 = vsel %vm634_vm9, %v1693_v39, %v1636_v51 }
 0x22c   : > { %v3369_v23 = vsel %vm634_vm9, %v3367_v33, %v3330_v53  ;;  %v3452_v53 = vld [vmem:[%s380_s8] sm:$0xff]  ;;  %s363_s8 = scalar_lea.vmem [#allocation3], %s3614_s27 }
 0x22d   : > { %s3481_s0 = sshll.u32 %s363_s8, 4  ;;  %s5790_s0 = int_to_ptr.vmem [resolvable:$true] %s3481_s0 }
 0x22e   : > { %v3295_v26 = vpop.permute.xlu0 %3294  ;;  %s3988_s23 = scalar_lea.vmem %s5790_s0, 256 }
 0x22f   : > { %v1676_v40 = vpop.permute.xlu1 %1675  ;;  %v3354_v14 = vsel %vm634_vm9, %v3352_v24, %v3295_v26  ;;  %p3989_p5 = scmp.ne.s32.totalorder %s5790_s0, %s3988_s23 }
 0x230   : > { %v1712_v54 = vsel %vm637_vm10, %v1710_v50, %v1676_v40 }
 0x231   : > { %p3990_p6 = pnand %p3989_p5, %p4222_p10 }
 0x232   : > { %v1641_v8 = vpop.permute.xlu0 %1640 }
 0x233   : > { %v3335_v63 = vpop.permute.xlu1 %3334  ;;  %v1697_v31 = vsel %vm637_vm10, %v1695_v45, %v1641_v8  ;;  %p3991_p7 = pneg %p3990_p6 }
 0x234   : > { %v3371_v20 = vsel %vm637_vm10, %v3369_v23, %v3335_v63  ;;  %v3441_v63 = vld [vmem:[%s376_s16] sm:$0xff]  ;;  %s4112_s16 = smov [#allocation3]  }
 0x235   : > { %s3992_s27 = sshll.u32 %s4112_s16, 4  ;;  %s3993_s27 = int_to_ptr.vmem [resolvable:$false] %s3992_s27 }
 0x236   : > { %v3300_v56 = vpop.permute.xlu0 %3299  ;;  %s3994_s21 = scalar_lea.vmem %s3993_s27, 512  ;;  %p3995_p8 = scmp.lt.s32.totalorder %s5790_s0, %s3993_s27 }
 0x237   : > { %v1681_v42 = vpop.permute.xlu1 %1680  ;;  %v3356_v60 = vsel %vm637_vm10, %v3354_v14, %v3300_v56  ;;  %p3996_p9 = scmp.lt.s32.totalorder %s3994_s21, %s3988_s23 }
 0x238   : > { %v1714_v2 = vsel %vm640_vm11, %v1712_v54, %v1681_v42 }
 0x239   : > { %p3997_p11 = por %p3996_p9, %p3995_p8 }
 0x23a   : > { %v1646_v15 = vpop.permute.xlu0 %1645 }
 0x23b   : > { %v3340_v58 = vpop.permute.xlu1 %3339  ;;  %v1699_v59 = vsel %vm640_vm11, %v1697_v31, %v1646_v15  ;;  %p3998_p13 = pnand %p3997_p11, %p3991_p7 }
 0x23c   : > { %v3373_v32 = vsel %vm640_vm11, %v3371_v20, %v3340_v58 }
 0x23e   : > { %v3305_v7 = vpop.permute.xlu0 %3304 }
 0x23f   : > { %v1686_v48 = vpop.permute.xlu1 %1685  ;;  %v3358_v27 = vsel %vm640_vm11, %v3356_v60, %v3305_v7 }
 0x240   : > { %v1716_v55 = vsel %vm643_vm12, %v1714_v2, %v1686_v48 }
 0x241   : > { %3683 = vmatprep.subr.msk.bf16.mxu1 %vm952_vm13, %v1716_v55 }
 0x242   : > { %v1651_v28 = vpop.permute.xlu0 %1650 }
 0x243   : > { %v1701_v38 = vsel %vm643_vm12, %v1699_v59, %v1651_v28  ;;  %v3345_v49 = vpop.permute.xlu1 %3344 }
 0x244   : > { %v1722_v9 = vsel %vm952_vm13, %v1701_v38, 0  ;;  %v3375_v57 = vsel %vm643_vm12, %v3373_v32, %v3345_v49 }
 0x245   : > { %1727 = vmatpush1.bf16.msra.mxu1 %v1722_v9  ;;  %3772 = vmatprep.subr.msk.bf16.mxu0 %vm952_vm13, %v3375_v57 }
 0x246   : > { %v3310_v22 = vpop.permute.xlu0 %3309 }
 0x247   : > { %v3360_v11 = vsel %vm643_vm12, %v3358_v27, %v3310_v22 }
 0x248   : > { %v3381_v18 = vsel %vm952_vm13, %v3360_v11, 0  ;;  %3684 = vmatmul.mubr.msk.bf16.vlgmr.msra.gmra.mrb[0].mxu1 %vm948_vm14, %v3682_v4 }
 0x249   : > { %3386 = vmatpush1.bf16.msra.mxu0 %v3381_v18 }
 0x24c   : > { %3773 = vmatmul.mubr.msk.bf16.vlgmr.msra.gmra.mrb[0].mxu0 %vm948_vm14, %v3771_v6 }
 0x31b   : > { %v1760_v30 = vpop.f32.mrb[0].mxu1 }
 0x31c   : > { %v1762_v52 = vpop.f32.mrb[1].mxu1 }
 0x31d   : > { %v1764_v44 = vpop.f32.mrb[2].mxu1 }
 0x31e   : > { %v1765_v37 = vpop.f32.mrb[3].mxu1 }
 0x31f   : > { %v3419_v43 = vpop.f32.mrb[0].mxu0 }
 0x320   : > { %v3852_v25 = vadd.f32 %v3419_v43, %v1760_v30  ;;  %v3421_v62 = vpop.f32.mrb[1].mxu0 }
 0x321   : > { %v3853_v16 = vadd.f32 %v3421_v62, %v1762_v52  ;;  %v3423_v35 = vpop.f32.mrb[2].mxu0 }
 0x322   : > { %v3424_v36 = vpop.f32.mrb[3].mxu0 }
 0x323   : > { %v3428_v5 = vadd.f32 %v3853_v16, %v3852_v25 }
 0x325   : > { %3429 = vadd.xlane.f32.xlu0 %v3428_v5 }
 0x3b2   : > { %v3430_v13 = vpop.xlane.xlu0 %3429 }
 0x3b3   : > { %v3432_v41 = vmul.f32 0.00390625, %v3430_v13 }
 0x3b5   : > { %v3433_v1 = vsub.f32 %v3852_v25, %v3432_v41  ;;  %v3434_v0 = vsub.f32 %v3853_v16, %v3432_v41 }
 0x3b7   : > { %v3435_v61 = vmul.f32 %v3433_v1, %v3433_v1  ;;  %v3436_v17 = vmul.f32 %v3434_v0, %v3434_v0 }
 0x3b9   : > { %v3437_v51 = vadd.f32 %v3436_v17, %v3435_v61 }
 0x3bb   : > { %3438 = vadd.xlane.f32.xlu1 %v3437_v51 }
 0x3cc   : > { %3455 = vperm.xlu1 %3985, %v3452_v53  }
 0x448   : > { %v3439_v26 = vpop.xlane.xlu1 %3438 }
 0x449   : > { %v3440_v40 = vmul.f32 0.00390625, %v3439_v26 }
 0x44b   : > { %v3442_v8 = vadd.f32 1e-05, %v3440_v40 }
 0x44c   : > { %v3456_v15 = vpop.permute.xlu1 %3455 }
 0x44d   : > { %3986 = vrsqrt.f32 %v3442_v8 }
 0x457   : > { %v3987_v56 = vpop.eup %3986 }
 0x458   : > { %v3444_v42 = vmul.f32 %v3987_v56, %v3441_v63 }
 0x45a   : > { %3447 = vperm.xlu0 %3984, %v3444_v42  }
 0x4d9   : > { %v3448_v19 = vpop.permute.xlu0 %3447 }
 0x4da   : > { %v3450_v34 = vmul.f32 %v3448_v19, %v3433_v1  ;;  %v3451_v58 = vmul.f32 %v3448_v19, %v3434_v0 }
 0x4dc   : > { %v3458_v29 = vadd.f32 %v3456_v15, %v3450_v34  ;;  %v3459_v12 = vadd.f32 %v3456_v15, %v3451_v58 }
 0x4de   : > { %v3460_v50 = vmax.f32 %v3458_v29, 0.0  ;;  %v3461_v10 = vmax.f32 %v3459_v12, 0.0 }
 0x4e0   : > { %3462 = vst [vmem:[%s363_s8] sm:$0xff] %v3460_v50  ;;  %3463 = vst [vmem:[%s363_s8 + $0x8] sm:$0xff] %v3461_v10 }
 0x4e1   : > { %4001 = shalt.err (!%p3998_p13)
}
 0x4e2   : > { %s4002_s17 = scalar_lea.hbm %s5788_s12, 256  ;;  %s4006_s9 = scalar_lea.hbm %s5852_s5, 1024 }
 0x4e3   : > { %p4003_p0 = scmp.ne.s32.totalorder %s5788_s12, %s4002_s17  ;;  %p4007_p3 = scmp.lt.u32.totalorder %s5788_s12, %s5852_s5 }
 0x4e4   : > { %p4008_p4 = scmp.lt.u32.totalorder %s4006_s9, %s4002_s17  ;;  %p4010_p6 = scmp.lt.u32.totalorder %s4002_s17, %s5788_s12 }
 0x4e5   : > { %p4004_p1 = pnand %p4003_p0, %p4222_p10 }
 0x4e6   : > { %p4009_p5 = por %p4008_p4, %p4007_p3 }
 0x4e7   : > { %p4005_p2 = pneg %p4004_p1 }
 0x4e8   : > { %p4011_p7 = por %p4010_p6, %p4009_p5 }
 0x4ea   : > { %p4012_p8 = pnand %p4011_p7, %p4005_p2 }
 0x4ec   : > { %4015 = shalt.err (!%p4012_p8)
}
 0x4ed   : > { %3885 = dma.vmem_to_hbm [thread:$0]  (%p4222_p10), %s5790_s0, 256, %s5788_s12, %s3465_s22  }
 0x4ee PF: > { %p3891_p9 = scmp.ge.s32.totalorder %s4098_s26, 2  ;;  %s3493_s11 = sand.u32 1, %s4062_s18  }
 0x4ef   : > { %s3494_s23 = scalar_lea.sflag [#allocation4], %s3493_s11 }
 0x4f0   : > { %p3888_p11 = pnand %p3891_p9, %p4229_p12 }
 0x4f2   : > { %4057 = dma.done.wait (!%p3888_p11), %s3494_s23, 256  }
 0x4f3   : > { %4059 = vsyncadd (!%p3888_p11), %s3494_s23, 4294967040  ;;  %s18_s26 = sadd.s32 1, %s4098_s26   ;;  %s5961_s18 = smov %s4066_s19 }
 0x4f4   : > { %p15_p13 = scmp.ge.s32.totalorder %s18_s26, 6   ;;  %s5962_s19 = smov %s4070_s20 }
 0x4f5   : > { %s5963_s20 = smov %s4227_s14  ;;  %s5964_s21 = smov %s4078_s2 }
 0x4f6   : > { %s5965_s2 = smov %s4216_s10  ;;  %s5966_s22 = smov %s4090_s24 }
 0x4f7   : > { %s5967_s23 = smov %s4094_s25  ;;  %s5968_s24 = smov %s5971_s29 }
 0x4f8   : > { %s5969_s25 = smov %s5975_s30  ;;  %17 = sbr.rel (!%p15_p13) target bundleno = 8 (0x8), region = 141 }
 0x4ff   :  { %3499 = vsyncpa [#allocation4], 1 }
 0x500   :  { %3501 = vsyncpa [#allocation4 + $0x1], 1 }

</bundles_post_ra>
